<compile_context>
chip_gen: v7x
topology: tpu7x:2x2x1
jax: 0.10.0
libtpu: 0.0.40
codegen_flags: <defaults>
</compile_context>

<pallas_src>
import math

import jax
import jax.numpy as jnp
from jax import lax
from jax.experimental import pallas as pl
from jax.experimental.pallas import tpu as pltpu

LN_EPS = 1e-5  # PyTorch nn.LayerNorm default


def _layer_norm(x, g, b):
    # Two-pass (centered) variance for numerical stability.
    mean = jnp.mean(x, axis=-1, keepdims=True)
    xc = x - mean
    var = jnp.mean(xc * xc, axis=-1, keepdims=True)
    return xc * lax.rsqrt(var + LN_EPS) * g + b


def _make_kernel(batch_block, n_multiv, window, n_kernels_pad, d_model,
                 n_head, d_k, d_v, mm_dtype):
    L = n_multiv
    M = batch_block * L
    dq = n_head * d_k
    scale = 1.0 / math.sqrt(d_k)

    def kernel(x_ref, cw_ref, cb_ref, wi_ref, bi_ref,
               wqkv_ref, bqkv_ref, wo_ref, bo_ref,
               g1_ref, be1_ref, w1_ref, b1_ref, w2_ref, b2_ref,
               g2_ref, be2_ref, wout_ref, bout_ref,
               o_ref, h_scr):
        layer = pl.program_id(1)

        # ---- stage 0 (first layer step only): conv + ReLU + in_linear ----------
        @pl.when(layer == 0)
        def _():
            # Conv2d(1, n_kernels, (window, 1)) collapses the window axis -> matmul
            # over the lane (last) axis of the pre-transposed x block.
            x = x_ref[...].reshape(M, window).astype(mm_dtype)
            conv = jnp.dot(x, cw_ref[...], preferred_element_type=jnp.float32)
            conv = jnp.maximum(conv + cb_ref[...], 0.0)        # ReLU
            # TODO(synk): all dropout layers are identity here (inference mode).
            h_scr[...] = jnp.dot(conv.astype(mm_dtype), wi_ref[...],
                                 preferred_element_type=jnp.float32) + bi_ref[...]

        h = h_scr[...]                                          # (M, d_model) f32

        # ---- encoder layer `layer` (its weights streamed by BlockSpec) ---------
        # Fused Q|K|V projection on the full batch slab: one MXU-sized matmul.
        qkv = jnp.dot(h.astype(mm_dtype), wqkv_ref[0],
                      preferred_element_type=jnp.float32) + bqkv_ref[0]

        attn = jnp.zeros((M, d_model), jnp.float32)
        for hd in range(n_head):                                # short static loop
            qh = qkv[:, hd * d_k:(hd + 1) * d_k].reshape(batch_block, L, d_k)
            kh = qkv[:, dq + hd * d_k:dq + (hd + 1) * d_k].reshape(batch_block, L, d_k)
            vh = qkv[:, 2 * dq + hd * d_v:2 * dq + (hd + 1) * d_v].reshape(batch_block, L, d_v)
            # Batched over the sample axis (rank-3 dot, flash-attention pattern).
            s = jnp.einsum('bqd,bkd->bqk', qh.astype(mm_dtype), kh.astype(mm_dtype),
                           preferred_element_type=jnp.float32) * scale
            s = s - jnp.max(s, axis=-1, keepdims=True)
            e = jnp.exp(s)
            p = e * pl.reciprocal(jnp.sum(e, axis=-1, keepdims=True), approx=True)
            ctx = jnp.einsum('bqk,bkd->bqd', p.astype(mm_dtype), vh.astype(mm_dtype),
                             preferred_element_type=jnp.float32)  # (b, L, d_v)
            # Accumulate this head's output projection directly (no lane concat).
            attn = attn + jnp.dot(ctx.reshape(M, d_v).astype(mm_dtype),
                                  wo_ref[0, hd],
                                  preferred_element_type=jnp.float32)
        attn = attn + bo_ref[0]
        res1 = _layer_norm(attn + h, g1_ref[0], be1_ref[0])

        hid = jnp.maximum(jnp.dot(res1.astype(mm_dtype), w1_ref[0],
                                  preferred_element_type=jnp.float32) + b1_ref[0], 0.0)
        ffn = jnp.dot(hid.astype(mm_dtype), w2_ref[0],
                      preferred_element_type=jnp.float32) + b2_ref[0]
        h_new = _layer_norm(ffn + res1, g2_ref[0], be2_ref[0])
        h_scr[...] = h_new

        # ---- final stage: out_linear, lane-dense (128-padded) store ------------
        @pl.when(layer == pl.num_programs(1) - 1)
        def _():
            out = jnp.dot(h_new.astype(mm_dtype), wout_ref[...],
                          preferred_element_type=jnp.float32) + bout_ref[...]
            o_ref[...] = out.reshape(batch_block, L, n_kernels_pad)

    return kernel


def single_global_selfattn_forward(x, params, *, n_layers, n_head, d_k, d_v,
                                   n_kernels, batch_block=None):
    B, window, n_multiv = x.shape
    d_model = params["w_in"].shape[1]
    d_inner = params["w1"].shape[2]
    n_k_pad = params["w_out"].shape[1]
    mm_dtype = params["wqkv"].dtype
    dq, dv = n_head * d_k, n_head * d_v
    e_qkv = 2 * dq + dv

    # Target ~256 activation rows per grid step (MXU-sized M); must divide B.
    if batch_block is None:
        batch_block = max(1, min(B, 256 // max(1, n_multiv)))
        while B % batch_block:
            batch_block -= 1
    assert B % batch_block == 0
    n_blocks = B // batch_block
    M = batch_block * n_multiv

    # Wrapper-side layout plumbing: conv contraction over the lane (last) axis.
    x_t = jnp.transpose(x, (0, 2, 1))                 # (B, n_multiv, window)

    rep2 = lambda b, l: (0, 0)
    lyr3 = lambda b, l: (l, 0, 0)
    lyr4 = lambda b, l: (l, 0, 0, 0)

    in_specs = [
        pl.BlockSpec((batch_block, n_multiv, window), lambda b, l: (b, 0, 0)),
        pl.BlockSpec(params["conv_w"].shape, rep2),
        pl.BlockSpec(params["conv_b"].shape, rep2),
        pl.BlockSpec(params["w_in"].shape, rep2),
        pl.BlockSpec(params["b_in"].shape, rep2),
        pl.BlockSpec((1, d_model, e_qkv), lyr3),
        pl.BlockSpec((1, 1, e_qkv), lyr3),
        pl.BlockSpec((1, n_head, d_v, d_model), lyr4),
        pl.BlockSpec((1, 1, d_model), lyr3),
        pl.BlockSpec((1, 1, d_model), lyr3),
        pl.BlockSpec((1, 1, d_model), lyr3),
        pl.BlockSpec((1, d_model, d_inner), lyr3),
        pl.BlockSpec((1, 1, d_inner), lyr3),
        pl.BlockSpec((1, d_inner, d_model), lyr3),
        pl.BlockSpec((1, 1, d_model), lyr3),
        pl.BlockSpec((1, 1, d_model), lyr3),
        pl.BlockSpec((1, 1, d_model), lyr3),
        pl.BlockSpec(params["w_out"].shape, rep2),
        pl.BlockSpec(params["b_out"].shape, rep2),
    ]

    # --- VMEM budget: one layer of weights (double-buffered) + statics + I/O. ---
    layer_keys = ("wqkv", "bqkv", "wo", "bo", "ln1_g", "ln1_b",
                  "w1", "b1", "w2", "b2", "ln2_g", "ln2_b")
    static_keys = ("conv_w", "conv_b", "w_in", "b_in", "w_out", "b_out")
    layer_blk = sum(params[k].size * params[k].dtype.itemsize // n_layers
                    for k in layer_keys)
    static_blk = sum(params[k].size * params[k].dtype.itemsize for k in static_keys)
    io_blk = M * window * 4 + M * n_k_pad * 4
    vmem_limit = int(min(64 << 20,
                         max(16 << 20,
                             2 * (layer_blk + static_blk + io_blk)
                             + M * d_model * 4 + (4 << 20))))

    # --- Advisory cost estimate for the XLA scheduler. ---
    flops_per_layer = (2 * M * d_model * e_qkv
                       + 2 * batch_block * n_head * n_multiv * n_multiv * (d_k + d_v)
                       + n_head * 2 * M * d_v * d_model
                       + 4 * M * d_model * d_inner)
    flops = n_blocks * (2 * M * window * n_kernels
                        + 2 * M * n_kernels * d_model
                        + 2 * M * d_model * n_k_pad
                        + n_layers * flops_per_layer)
    transcendentals = n_blocks * n_layers * batch_block * n_head * n_multiv * n_multiv
    param_bytes = sum(v.size * v.dtype.itemsize for v in params.values())
    bytes_accessed = (x.size * x.dtype.itemsize
                      + B * n_multiv * n_k_pad * 4
                      + n_blocks * param_bytes)
    cost = pl.CostEstimate(flops=int(flops), transcendentals=int(transcendentals),
                           bytes_accessed=int(bytes_accessed))

    out = pl.pallas_call(
        _make_kernel(batch_block, n_multiv, window, n_k_pad, d_model,
                     n_head, d_k, d_v, mm_dtype),
        out_shape=jax.ShapeDtypeStruct((B, n_multiv, n_k_pad), jnp.float32),
        grid=(n_blocks, n_layers),
        in_specs=in_specs,
        out_specs=pl.BlockSpec((batch_block, n_multiv, n_k_pad),
                               lambda b, l: (b, 0, 0)),
        scratch_shapes=[pltpu.VMEM((M, d_model), jnp.float32)],
        compiler_params=pltpu.CompilerParams(
            dimension_semantics=("parallel", "arbitrary"),
            vmem_limit_bytes=vmem_limit),
        cost_estimate=cost,
    )(x_t, params["conv_w"], params["conv_b"], params["w_in"], params["b_in"],
      params["wqkv"], params["bqkv"], params["wo"], params["bo"],
      params["ln1_g"], params["ln1_b"], params["w1"], params["b1"],
      params["w2"], params["b2"], params["ln2_g"], params["ln2_b"],
      params["w_out"], params["b_out"])

    return out[:, :, :n_kernels]                     # drop the lane padding


# ---------------------------------------------------------------------------
# Module wrapper with deterministic parameter init
# ---------------------------------------------------------------------------
class SingleGlobalSelfAttnPallas:
    def __init__(self, key, window, n_multiv, n_kernels, w_kernel,
                 d_k, d_v, d_model, d_inner, n_layers, n_head,
                 matmul_dtype=jnp.bfloat16):
        assert w_kernel == 1, "kernel assumes w_kernel == 1 (the module default)"
        self.window, self.n_multiv, self.n_kernels = window, n_multiv, n_kernels
        self.n_layers, self.n_head, self.d_k, self.d_v = n_layers, n_head, d_k, d_v

        self._ctr = 0

        def init(shape, dtype=matmul_dtype, scale=0.1):
            self._ctr += 1
            k = jax.random.fold_in(key, self._ctr)
            return (scale * jax.random.normal(k, shape)).astype(dtype)

        dq, dv = n_head * d_k, n_head * d_v
        n_k_pad = ((n_kernels + 127) // 128) * 128
        p = {}
        # Conv2d(1, n_kernels, (window, 1)) weight stored pre-transposed (window, n_kernels).
        p["conv_w"] = init((window, n_kernels))
        p["conv_b"] = init((1, n_kernels), jnp.float32)
        p["w_in"] = init((n_kernels, d_model))
        p["b_in"] = init((1, d_model), jnp.float32)
        # Fused Q|K|V projection (== 3 Linears); per-layer weights stacked on axis 0.
        p["wqkv"] = init((n_layers, d_model, 2 * dq + dv))
        p["bqkv"] = init((n_layers, 1, 2 * dq + dv), jnp.float32)
        # Output projection stored head-major: (n_layers, n_head, d_v, d_model).
        p["wo"] = init((n_layers, n_head, d_v, d_model))
        p["bo"] = init((n_layers, 1, d_model), jnp.float32)
        p["ln1_g"] = jnp.ones((n_layers, 1, d_model), jnp.float32)
        p["ln1_b"] = jnp.zeros((n_layers, 1, d_model), jnp.float32)
        p["w1"] = init((n_layers, d_model, d_inner))
        p["b1"] = init((n_layers, 1, d_inner), jnp.float32)
        p["w2"] = init((n_layers, d_inner, d_model))
        p["b2"] = init((n_layers, 1, d_model), jnp.float32)
        p["ln2_g"] = jnp.ones((n_layers, 1, d_model), jnp.float32)
        p["ln2_b"] = jnp.zeros((n_layers, 1, d_model), jnp.float32)
        # out_linear zero-padded on the lane axis to a multiple of 128 (dense stores).
        w_out = init((d_model, n_kernels))
        b_out = init((1, n_kernels), jnp.float32)
        p["w_out"] = jnp.zeros((d_model, n_k_pad), matmul_dtype).at[:, :n_kernels].set(w_out)
        p["b_out"] = jnp.zeros((1, n_k_pad), jnp.float32).at[:, :n_kernels].set(b_out)
        self.params = p

    def __call__(self, x, mode=None):
        # mode-dependent n_multiv bookkeeping is shape glue; x already carries the
        # effective n_multiv, so only the view/conv/encoder math runs here.
        x = x.reshape(-1, self.window, self.n_multiv)
        out = single_global_selfattn_forward(
            x, self.params, n_layers=self.n_layers, n_head=self.n_head,
            d_k=self.d_k, d_v=self.d_v, n_kernels=self.n_kernels)
        return (out,)


if __name__ == "__main__":
    # Small, module-consistent shapes.
    B, window, n_multiv = 2, 16, 8
    n_kernels, w_kernel = 32, 1
    d_model, d_inner, n_layers, n_head = 32, 64, 2, 4
    d_k = d_v = d_model // n_head

    key = jax.random.PRNGKey(0)
    k_param, k_x = jax.random.split(key)
    model = SingleGlobalSelfAttnPallas(k_param, window, n_multiv, n_kernels,
                                       w_kernel, d_k, d_v, d_model, d_inner,
                                       n_layers, n_head)
    x = jax.random.normal(k_x, (B, window, n_multiv), dtype=jnp.float32)

    (out,) = model(x, mode="none")
    out = jax.block_until_ready(out)
    assert out.shape == (B, n_multiv, n_kernels), out.shape
    assert bool(jnp.all(jnp.isfinite(out)))
    print("KERNEL_OK")
</pallas_src>

<mosaic_0001>
module attributes {stable_mosaic.version = 11 : i64} {
  func.func @kernel(%arg0: i32, %arg1: i32, %arg2: memref<2x8x16xf32, #tpu.memory_space<vmem>>, %arg3: memref<16x32xbf16, #tpu.memory_space<vmem>>, %arg4: memref<1x32xf32, #tpu.memory_space<vmem>>, %arg5: memref<32x32xbf16, #tpu.memory_space<vmem>>, %arg6: memref<1x32xf32, #tpu.memory_space<vmem>>, %arg7: memref<1x32x96xbf16, #tpu.memory_space<vmem>>, %arg8: memref<1x1x96xf32, #tpu.memory_space<vmem>>, %arg9: memref<1x4x8x32xbf16, #tpu.memory_space<vmem>>, %arg10: memref<1x1x32xf32, #tpu.memory_space<vmem>>, %arg11: memref<1x1x32xf32, #tpu.memory_space<vmem>>, %arg12: memref<1x1x32xf32, #tpu.memory_space<vmem>>, %arg13: memref<1x32x64xbf16, #tpu.memory_space<vmem>>, %arg14: memref<1x1x64xf32, #tpu.memory_space<vmem>>, %arg15: memref<1x64x32xbf16, #tpu.memory_space<vmem>>, %arg16: memref<1x1x32xf32, #tpu.memory_space<vmem>>, %arg17: memref<1x1x32xf32, #tpu.memory_space<vmem>>, %arg18: memref<1x1x32xf32, #tpu.memory_space<vmem>>, %arg19: memref<32x128xbf16, #tpu.memory_space<vmem>>, %arg20: memref<1x128xf32, #tpu.memory_space<vmem>>, %arg21: memref<2x8x128xf32, #tpu.memory_space<vmem>>, %arg22: memref<16x32xf32, #tpu.memory_space<vmem>>) attributes {dimension_semantics = [#tpu.dimension_semantics<parallel>, #tpu.dimension_semantics<arbitrary>], iteration_bounds = array<i64: 1, 2>, scalar_prefetch = 0 : i64, scratch_operands = 1 : i64, tpu.core_type = #tpu.core_type<tc>, window_params = [{transform_indices = @transform_0, window_bounds = array<i64: 2, 8, 16>}, {pipeline_mode = #tpu.pipeline_mode<synchronous>, transform_indices = @transform_1, window_bounds = array<i64: 16, 32>}, {pipeline_mode = #tpu.pipeline_mode<synchronous>, transform_indices = @transform_2, window_bounds = array<i64: 1, 32>}, {pipeline_mode = #tpu.pipeline_mode<synchronous>, transform_indices = @transform_3, window_bounds = array<i64: 32, 32>}, {pipeline_mode = #tpu.pipeline_mode<synchronous>, transform_indices = @transform_4, window_bounds = array<i64: 1, 32>}, {transform_indices = @transform_5, window_bounds = array<i64: 1, 32, 96>}, {transform_indices = @transform_6, window_bounds = array<i64: 1, 1, 96>}, {transform_indices = @transform_7, window_bounds = array<i64: 1, 4, 8, 32>}, {transform_indices = @transform_8, window_bounds = array<i64: 1, 1, 32>}, {transform_indices = @transform_9, window_bounds = array<i64: 1, 1, 32>}, {transform_indices = @transform_10, window_bounds = array<i64: 1, 1, 32>}, {transform_indices = @transform_11, window_bounds = array<i64: 1, 32, 64>}, {transform_indices = @transform_12, window_bounds = array<i64: 1, 1, 64>}, {transform_indices = @transform_13, window_bounds = array<i64: 1, 64, 32>}, {transform_indices = @transform_14, window_bounds = array<i64: 1, 1, 32>}, {transform_indices = @transform_15, window_bounds = array<i64: 1, 1, 32>}, {transform_indices = @transform_16, window_bounds = array<i64: 1, 1, 32>}, {pipeline_mode = #tpu.pipeline_mode<synchronous>, transform_indices = @transform_17, window_bounds = array<i64: 32, 128>}, {pipeline_mode = #tpu.pipeline_mode<synchronous>, transform_indices = @transform_18, window_bounds = array<i64: 1, 128>}, {transform_indices = @transform_19, window_bounds = array<i64: 2, 8, 128>}]} {
    %c0_i32 = arith.constant 0 : i32
    %0 = arith.cmpi eq, %arg1, %c0_i32 : i32
    %1 = arith.extui %0 : i1 to i32
    %c0_i32_0 = arith.constant 0 : i32
    %2 = arith.cmpi ne, %1, %c0_i32_0 : i32
    scf.if %2 {
      %c0_89 = arith.constant 0 : index
      %c0_90 = arith.constant 0 : index
      %c0_91 = arith.constant 0 : index
      %209 = vector.load %arg2[%c0_89, %c0_90, %c0_91] : memref<2x8x16xf32, #tpu.memory_space<vmem>>, vector<2x8x16xf32>
      %210 = vector.shape_cast %209 : vector<2x8x16xf32> to vector<16x16xf32>
      %211 = arith.truncf %210 : vector<16x16xf32> to vector<16x16xbf16>
      %c0_92 = arith.constant 0 : index
      %c0_93 = arith.constant 0 : index
      %212 = vector.load %arg3[%c0_92, %c0_93] : memref<16x32xbf16, #tpu.memory_space<vmem>>, vector<16x32xbf16>
      %cst_94 = arith.constant dense<0.000000e+00> : vector<16x32xf32>
      %213 = tpu.matmul %211, %212, %cst_94 {dimension_numbers = #tpu.dot_dimension_numbers<[1], [0], [0], [1], [0, 0, 1, 1], [], []>} : vector<16x16xbf16>, vector<16x32xbf16>, vector<16x32xf32> -> vector<16x32xf32>
      %c0_95 = arith.constant 0 : index
      %c0_96 = arith.constant 0 : index
      %214 = vector.load %arg4[%c0_95, %c0_96] : memref<1x32xf32, #tpu.memory_space<vmem>>, vector<1x32xf32>
      %215 = vector.broadcast %214 : vector<1x32xf32> to vector<16x32xf32>
      %216 = arith.addf %213, %215 : vector<16x32xf32>
      %cst_97 = arith.constant 0.000000e+00 : f32
      %217 = vector.broadcast %cst_97 : f32 to vector<16x32xf32>
      %218 = arith.maximumf %216, %217 : vector<16x32xf32>
      %219 = arith.truncf %218 : vector<16x32xf32> to vector<16x32xbf16>
      %c0_98 = arith.constant 0 : index
      %c0_99 = arith.constant 0 : index
      %220 = vector.load %arg5[%c0_98, %c0_99] : memref<32x32xbf16, #tpu.memory_space<vmem>>, vector<32x32xbf16>
      %cst_100 = arith.constant dense<0.000000e+00> : vector<16x32xf32>
      %221 = tpu.matmul %219, %220, %cst_100 {dimension_numbers = #tpu.dot_dimension_numbers<[1], [0], [0], [1], [0, 0, 1, 1], [], []>} : vector<16x32xbf16>, vector<32x32xbf16>, vector<16x32xf32> -> vector<16x32xf32>
      %c0_101 = arith.constant 0 : index
      %c0_102 = arith.constant 0 : index
      %222 = vector.load %arg6[%c0_101, %c0_102] : memref<1x32xf32, #tpu.memory_space<vmem>>, vector<1x32xf32>
      %223 = vector.broadcast %222 : vector<1x32xf32> to vector<16x32xf32>
      %224 = arith.addf %221, %223 : vector<16x32xf32>
      %c0_103 = arith.constant 0 : index
      %c0_104 = arith.constant 0 : index
      %225 = vector.load %arg22[%c0_103, %c0_104] : memref<16x32xf32, #tpu.memory_space<vmem>>, vector<16x32xf32>
      tpu.vector_store %arg22[%c0_103, %c0_104], %224 {strides = array<i32>} : memref<16x32xf32, #tpu.memory_space<vmem>>, vector<16x32xf32>,
    } else {
    }
    %c0 = arith.constant 0 : index
    %c0_1 = arith.constant 0 : index
    %3 = vector.load %arg22[%c0, %c0_1] : memref<16x32xf32, #tpu.memory_space<vmem>>, vector<16x32xf32>
    %4 = arith.truncf %3 : vector<16x32xf32> to vector<16x32xbf16>
    %c0_2 = arith.constant 0 : index
    %c0_3 = arith.constant 0 : index
    %c0_4 = arith.constant 0 : index
    %5 = vector.load %arg7[%c0_2, %c0_3, %c0_4] : memref<1x32x96xbf16, #tpu.memory_space<vmem>>, vector<1x32x96xbf16>
    %6 = vector.shape_cast %5 : vector<1x32x96xbf16> to vector<32x96xbf16>
    %cst = arith.constant dense<0.000000e+00> : vector<16x96xf32>
    %7 = tpu.matmul %4, %6, %cst {dimension_numbers = #tpu.dot_dimension_numbers<[1], [0], [0], [1], [0, 0, 1, 1], [], []>} : vector<16x32xbf16>, vector<32x96xbf16>, vector<16x96xf32> -> vector<16x96xf32>
    %c0_5 = arith.constant 0 : index
    %c0_6 = arith.constant 0 : index
    %c0_7 = arith.constant 0 : index
    %8 = vector.load %arg8[%c0_5, %c0_6, %c0_7] : memref<1x1x96xf32, #tpu.memory_space<vmem>>, vector<1x1x96xf32>
    %9 = vector.shape_cast %8 : vector<1x1x96xf32> to vector<1x96xf32>
    %10 = vector.broadcast %9 : vector<1x96xf32> to vector<16x96xf32>
    %11 = arith.addf %7, %10 : vector<16x96xf32>
    %cst_8 = arith.constant 0.000000e+00 : f32
    %12 = vector.broadcast %cst_8 : f32 to vector<16x32xf32>
    %13 = vector.extract_strided_slice %11 {offsets = [0, 0], sizes = [16, 8], strides = [1, 1]} : vector<16x96xf32> to vector<16x8xf32>
    %14 = vector.shape_cast %13 : vector<16x8xf32> to vector<2x8x8xf32>
    %15 = vector.extract_strided_slice %11 {offsets = [0, 32], sizes = [16, 8], strides = [1, 1]} : vector<16x96xf32> to vector<16x8xf32>
    %16 = vector.shape_cast %15 : vector<16x8xf32> to vector<2x8x8xf32>
    %17 = vector.extract_strided_slice %11 {offsets = [0, 64], sizes = [16, 8], strides = [1, 1]} : vector<16x96xf32> to vector<16x8xf32>
    %18 = vector.shape_cast %17 : vector<16x8xf32> to vector<2x8x8xf32>
    %19 = arith.truncf %14 : vector<2x8x8xf32> to vector<2x8x8xbf16>
    %20 = arith.truncf %16 : vector<2x8x8xf32> to vector<2x8x8xbf16>
    "tpu.trace_start"() <{level = 10 : i32, message = "bqd,bkd->bqk"}> : () -> ()
    %cst_9 = arith.constant dense<0.000000e+00> : vector<2x8x8xf32>
    %21 = tpu.matmul %19, %20, %cst_9 {dimension_numbers = #tpu.dot_dimension_numbers<[2], [2], [1], [1], [0, 0, 0, 1, 1, 1], [0], [0]>} : vector<2x8x8xbf16>, vector<2x8x8xbf16>, vector<2x8x8xf32> -> vector<2x8x8xf32>
    "tpu.trace_stop"() : () -> ()
    %cst_10 = arith.constant 0.353553385 : f32
    %22 = vector.broadcast %cst_10 : f32 to vector<2x8x8xf32>
    %23 = arith.mulf %21, %22 : vector<2x8x8xf32>
    %cst_11 = arith.constant dense<0xFF800000> : vector<2x8xf32>
    %24 = vector.multi_reduction <maximumf>, %23, %cst_11 [2] : vector<2x8x8xf32> to vector<2x8xf32>
    %25 = vector.shape_cast %24 : vector<2x8xf32> to vector<2x8x1xf32>
    %26 = vector.broadcast %25 : vector<2x8x1xf32> to vector<2x8x8xf32>
    %27 = arith.subf %23, %26 : vector<2x8x8xf32>
    %28 = math.exp %27 : vector<2x8x8xf32>
    %cst_12 = arith.constant dense<0.000000e+00> : vector<2x8xf32>
    %29 = vector.multi_reduction <add>, %28, %cst_12 [2] : vector<2x8x8xf32> to vector<2x8xf32>
    %30 = vector.shape_cast %29 : vector<2x8xf32> to vector<2x8x1xf32>
    %31 = tpu.reciprocal %30 {approx = true} : vector<2x8x1xf32> -> vector<2x8x1xf32>
    %32 = vector.broadcast %31 : vector<2x8x1xf32> to vector<2x8x8xf32>
    %33 = arith.mulf %28, %32 : vector<2x8x8xf32>
    %34 = arith.truncf %33 : vector<2x8x8xf32> to vector<2x8x8xbf16>
    %35 = arith.truncf %18 : vector<2x8x8xf32> to vector<2x8x8xbf16>
    "tpu.trace_start"() <{level = 10 : i32, message = "bqk,bkd->bqd"}> : () -> ()
    %cst_13 = arith.constant dense<0.000000e+00> : vector<2x8x8xf32>
    %36 = tpu.matmul %34, %35, %cst_13 {dimension_numbers = #tpu.dot_dimension_numbers<[2], [1], [1], [2], [0, 0, 0, 1, 1, 2], [0], [0]>} : vector<2x8x8xbf16>, vector<2x8x8xbf16>, vector<2x8x8xf32> -> vector<2x8x8xf32>
    "tpu.trace_stop"() : () -> ()
    %37 = vector.shape_cast %36 : vector<2x8x8xf32> to vector<16x8xf32>
    %38 = arith.truncf %37 : vector<16x8xf32> to vector<16x8xbf16>
    %c0_14 = arith.constant 0 : index
    %c0_15 = arith.constant 0 : index
    %c0_16 = arith.constant 0 : index
    %c0_17 = arith.constant 0 : index
    %39 = vector.load %arg9[%c0_14, %c0_15, %c0_16, %c0_17] : memref<1x4x8x32xbf16, #tpu.memory_space<vmem>>, vector<1x1x8x32xbf16>
    %40 = vector.shape_cast %39 : vector<1x1x8x32xbf16> to vector<8x32xbf16>
    %cst_18 = arith.constant dense<0.000000e+00> : vector<16x32xf32>
    %41 = tpu.matmul %38, %40, %cst_18 {dimension_numbers = #tpu.dot_dimension_numbers<[1], [0], [0], [1], [0, 0, 1, 1], [], []>} : vector<16x8xbf16>, vector<8x32xbf16>, vector<16x32xf32> -> vector<16x32xf32>
    %42 = arith.addf %12, %41 : vector<16x32xf32>
    %43 = vector.extract_strided_slice %11 {offsets = [0, 8], sizes = [16, 8], strides = [1, 1]} : vector<16x96xf32> to vector<16x8xf32>
    %44 = vector.shape_cast %43 : vector<16x8xf32> to vector<2x8x8xf32>
    %45 = vector.extract_strided_slice %11 {offsets = [0, 40], sizes = [16, 8], strides = [1, 1]} : vector<16x96xf32> to vector<16x8xf32>
    %46 = vector.shape_cast %45 : vector<16x8xf32> to vector<2x8x8xf32>
    %47 = vector.extract_strided_slice %11 {offsets = [0, 72], sizes = [16, 8], strides = [1, 1]} : vector<16x96xf32> to vector<16x8xf32>
    %48 = vector.shape_cast %47 : vector<16x8xf32> to vector<2x8x8xf32>
    %49 = arith.truncf %44 : vector<2x8x8xf32> to vector<2x8x8xbf16>
    %50 = arith.truncf %46 : vector<2x8x8xf32> to vector<2x8x8xbf16>
    "tpu.trace_start"() <{level = 10 : i32, message = "bqd,bkd->bqk"}> : () -> ()
    %cst_19 = arith.constant dense<0.000000e+00> : vector<2x8x8xf32>
    %51 = tpu.matmul %49, %50, %cst_19 {dimension_numbers = #tpu.dot_dimension_numbers<[2], [2], [1], [1], [0, 0, 0, 1, 1, 1], [0], [0]>} : vector<2x8x8xbf16>, vector<2x8x8xbf16>, vector<2x8x8xf32> -> vector<2x8x8xf32>
    "tpu.trace_stop"() : () -> ()
    %cst_20 = arith.constant 0.353553385 : f32
    %52 = vector.broadcast %cst_20 : f32 to vector<2x8x8xf32>
    %53 = arith.mulf %51, %52 : vector<2x8x8xf32>
    %cst_21 = arith.constant dense<0xFF800000> : vector<2x8xf32>
    %54 = vector.multi_reduction <maximumf>, %53, %cst_21 [2] : vector<2x8x8xf32> to vector<2x8xf32>
    %55 = vector.shape_cast %54 : vector<2x8xf32> to vector<2x8x1xf32>
    %56 = vector.broadcast %55 : vector<2x8x1xf32> to vector<2x8x8xf32>
    %57 = arith.subf %53, %56 : vector<2x8x8xf32>
    %58 = math.exp %57 : vector<2x8x8xf32>
    %cst_22 = arith.constant dense<0.000000e+00> : vector<2x8xf32>
    %59 = vector.multi_reduction <add>, %58, %cst_22 [2] : vector<2x8x8xf32> to vector<2x8xf32>
    %60 = vector.shape_cast %59 : vector<2x8xf32> to vector<2x8x1xf32>
    %61 = tpu.reciprocal %60 {approx = true} : vector<2x8x1xf32> -> vector<2x8x1xf32>
    %62 = vector.broadcast %61 : vector<2x8x1xf32> to vector<2x8x8xf32>
    %63 = arith.mulf %58, %62 : vector<2x8x8xf32>
    %64 = arith.truncf %63 : vector<2x8x8xf32> to vector<2x8x8xbf16>
    %65 = arith.truncf %48 : vector<2x8x8xf32> to vector<2x8x8xbf16>
    "tpu.trace_start"() <{level = 10 : i32, message = "bqk,bkd->bqd"}> : () -> ()
    %cst_23 = arith.constant dense<0.000000e+00> : vector<2x8x8xf32>
    %66 = tpu.matmul %64, %65, %cst_23 {dimension_numbers = #tpu.dot_dimension_numbers<[2], [1], [1], [2], [0, 0, 0, 1, 1, 2], [0], [0]>} : vector<2x8x8xbf16>, vector<2x8x8xbf16>, vector<2x8x8xf32> -> vector<2x8x8xf32>
    "tpu.trace_stop"() : () -> ()
    %67 = vector.shape_cast %66 : vector<2x8x8xf32> to vector<16x8xf32>
    %68 = arith.truncf %67 : vector<16x8xf32> to vector<16x8xbf16>
    %c0_24 = arith.constant 0 : index
    %c1 = arith.constant 1 : index
    %c0_25 = arith.constant 0 : index
    %c0_26 = arith.constant 0 : index
    %69 = vector.load %arg9[%c0_24, %c1, %c0_25, %c0_26] : memref<1x4x8x32xbf16, #tpu.memory_space<vmem>>, vector<1x1x8x32xbf16>
    %70 = vector.shape_cast %69 : vector<1x1x8x32xbf16> to vector<8x32xbf16>
    %cst_27 = arith.constant dense<0.000000e+00> : vector<16x32xf32>
    %71 = tpu.matmul %68, %70, %cst_27 {dimension_numbers = #tpu.dot_dimension_numbers<[1], [0], [0], [1], [0, 0, 1, 1], [], []>} : vector<16x8xbf16>, vector<8x32xbf16>, vector<16x32xf32> -> vector<16x32xf32>
    %72 = arith.addf %42, %71 : vector<16x32xf32>
    %73 = vector.extract_strided_slice %11 {offsets = [0, 16], sizes = [16, 8], strides = [1, 1]} : vector<16x96xf32> to vector<16x8xf32>
    %74 = vector.shape_cast %73 : vector<16x8xf32> to vector<2x8x8xf32>
    %75 = vector.extract_strided_slice %11 {offsets = [0, 48], sizes = [16, 8], strides = [1, 1]} : vector<16x96xf32> to vector<16x8xf32>
    %76 = vector.shape_cast %75 : vector<16x8xf32> to vector<2x8x8xf32>
    %77 = vector.extract_strided_slice %11 {offsets = [0, 80], sizes = [16, 8], strides = [1, 1]} : vector<16x96xf32> to vector<16x8xf32>
    %78 = vector.shape_cast %77 : vector<16x8xf32> to vector<2x8x8xf32>
    %79 = arith.truncf %74 : vector<2x8x8xf32> to vector<2x8x8xbf16>
    %80 = arith.truncf %76 : vector<2x8x8xf32> to vector<2x8x8xbf16>
    "tpu.trace_start"() <{level = 10 : i32, message = "bqd,bkd->bqk"}> : () -> ()
    %cst_28 = arith.constant dense<0.000000e+00> : vector<2x8x8xf32>
    %81 = tpu.matmul %79, %80, %cst_28 {dimension_numbers = #tpu.dot_dimension_numbers<[2], [2], [1], [1], [0, 0, 0, 1, 1, 1], [0], [0]>} : vector<2x8x8xbf16>, vector<2x8x8xbf16>, vector<2x8x8xf32> -> vector<2x8x8xf32>
    "tpu.trace_stop"() : () -> ()
    %cst_29 = arith.constant 0.353553385 : f32
    %82 = vector.broadcast %cst_29 : f32 to vector<2x8x8xf32>
    %83 = arith.mulf %81, %82 : vector<2x8x8xf32>
    %cst_30 = arith.constant dense<0xFF800000> : vector<2x8xf32>
    %84 = vector.multi_reduction <maximumf>, %83, %cst_30 [2] : vector<2x8x8xf32> to vector<2x8xf32>
    %85 = vector.shape_cast %84 : vector<2x8xf32> to vector<2x8x1xf32>
    %86 = vector.broadcast %85 : vector<2x8x1xf32> to vector<2x8x8xf32>
    %87 = arith.subf %83, %86 : vector<2x8x8xf32>
    %88 = math.exp %87 : vector<2x8x8xf32>
    %cst_31 = arith.constant dense<0.000000e+00> : vector<2x8xf32>
    %89 = vector.multi_reduction <add>, %88, %cst_31 [2] : vector<2x8x8xf32> to vector<2x8xf32>
    %90 = vector.shape_cast %89 : vector<2x8xf32> to vector<2x8x1xf32>
    %91 = tpu.reciprocal %90 {approx = true} : vector<2x8x1xf32> -> vector<2x8x1xf32>
    %92 = vector.broadcast %91 : vector<2x8x1xf32> to vector<2x8x8xf32>
    %93 = arith.mulf %88, %92 : vector<2x8x8xf32>
    %94 = arith.truncf %93 : vector<2x8x8xf32> to vector<2x8x8xbf16>
    %95 = arith.truncf %78 : vector<2x8x8xf32> to vector<2x8x8xbf16>
    "tpu.trace_start"() <{level = 10 : i32, message = "bqk,bkd->bqd"}> : () -> ()
    %cst_32 = arith.constant dense<0.000000e+00> : vector<2x8x8xf32>
    %96 = tpu.matmul %94, %95, %cst_32 {dimension_numbers = #tpu.dot_dimension_numbers<[2], [1], [1], [2], [0, 0, 0, 1, 1, 2], [0], [0]>} : vector<2x8x8xbf16>, vector<2x8x8xbf16>, vector<2x8x8xf32> -> vector<2x8x8xf32>
    "tpu.trace_stop"() : () -> ()
    %97 = vector.shape_cast %96 : vector<2x8x8xf32> to vector<16x8xf32>
    %98 = arith.truncf %97 : vector<16x8xf32> to vector<16x8xbf16>
    %c0_33 = arith.constant 0 : index
    %c2 = arith.constant 2 : index
    %c0_34 = arith.constant 0 : index
    %c0_35 = arith.constant 0 : index
    %99 = vector.load %arg9[%c0_33, %c2, %c0_34, %c0_35] : memref<1x4x8x32xbf16, #tpu.memory_space<vmem>>, vector<1x1x8x32xbf16>
    %100 = vector.shape_cast %99 : vector<1x1x8x32xbf16> to vector<8x32xbf16>
    %cst_36 = arith.constant dense<0.000000e+00> : vector<16x32xf32>
    %101 = tpu.matmul %98, %100, %cst_36 {dimension_numbers = #tpu.dot_dimension_numbers<[1], [0], [0], [1], [0, 0, 1, 1], [], []>} : vector<16x8xbf16>, vector<8x32xbf16>, vector<16x32xf32> -> vector<16x32xf32>
    %102 = arith.addf %72, %101 : vector<16x32xf32>
    %103 = vector.extract_strided_slice %11 {offsets = [0, 24], sizes = [16, 8], strides = [1, 1]} : vector<16x96xf32> to vector<16x8xf32>
    %104 = vector.shape_cast %103 : vector<16x8xf32> to vector<2x8x8xf32>
    %105 = vector.extract_strided_slice %11 {offsets = [0, 56], sizes = [16, 8], strides = [1, 1]} : vector<16x96xf32> to vector<16x8xf32>
    %106 = vector.shape_cast %105 : vector<16x8xf32> to vector<2x8x8xf32>
    %107 = vector.extract_strided_slice %11 {offsets = [0, 88], sizes = [16, 8], strides = [1, 1]} : vector<16x96xf32> to vector<16x8xf32>
    %108 = vector.shape_cast %107 : vector<16x8xf32> to vector<2x8x8xf32>
    %109 = arith.truncf %104 : vector<2x8x8xf32> to vector<2x8x8xbf16>
    %110 = arith.truncf %106 : vector<2x8x8xf32> to vector<2x8x8xbf16>
    "tpu.trace_start"() <{level = 10 : i32, message = "bqd,bkd->bqk"}> : () -> ()
    %cst_37 = arith.constant dense<0.000000e+00> : vector<2x8x8xf32>
    %111 = tpu.matmul %109, %110, %cst_37 {dimension_numbers = #tpu.dot_dimension_numbers<[2], [2], [1], [1], [0, 0, 0, 1, 1, 1], [0], [0]>} : vector<2x8x8xbf16>, vector<2x8x8xbf16>, vector<2x8x8xf32> -> vector<2x8x8xf32>
    "tpu.trace_stop"() : () -> ()
    %cst_38 = arith.constant 0.353553385 : f32
    %112 = vector.broadcast %cst_38 : f32 to vector<2x8x8xf32>
    %113 = arith.mulf %111, %112 : vector<2x8x8xf32>
    %cst_39 = arith.constant dense<0xFF800000> : vector<2x8xf32>
    %114 = vector.multi_reduction <maximumf>, %113, %cst_39 [2] : vector<2x8x8xf32> to vector<2x8xf32>
    %115 = vector.shape_cast %114 : vector<2x8xf32> to vector<2x8x1xf32>
    %116 = vector.broadcast %115 : vector<2x8x1xf32> to vector<2x8x8xf32>
    %117 = arith.subf %113, %116 : vector<2x8x8xf32>
    %118 = math.exp %117 : vector<2x8x8xf32>
    %cst_40 = arith.constant dense<0.000000e+00> : vector<2x8xf32>
    %119 = vector.multi_reduction <add>, %118, %cst_40 [2] : vector<2x8x8xf32> to vector<2x8xf32>
    %120 = vector.shape_cast %119 : vector<2x8xf32> to vector<2x8x1xf32>
    %121 = tpu.reciprocal %120 {approx = true} : vector<2x8x1xf32> -> vector<2x8x1xf32>
    %122 = vector.broadcast %121 : vector<2x8x1xf32> to vector<2x8x8xf32>
    %123 = arith.mulf %118, %122 : vector<2x8x8xf32>
    %124 = arith.truncf %123 : vector<2x8x8xf32> to vector<2x8x8xbf16>
    %125 = arith.truncf %108 : vector<2x8x8xf32> to vector<2x8x8xbf16>
    "tpu.trace_start"() <{level = 10 : i32, message = "bqk,bkd->bqd"}> : () -> ()
    %cst_41 = arith.constant dense<0.000000e+00> : vector<2x8x8xf32>
    %126 = tpu.matmul %124, %125, %cst_41 {dimension_numbers = #tpu.dot_dimension_numbers<[2], [1], [1], [2], [0, 0, 0, 1, 1, 2], [0], [0]>} : vector<2x8x8xbf16>, vector<2x8x8xbf16>, vector<2x8x8xf32> -> vector<2x8x8xf32>
    "tpu.trace_stop"() : () -> ()
    %127 = vector.shape_cast %126 : vector<2x8x8xf32> to vector<16x8xf32>
    %128 = arith.truncf %127 : vector<16x8xf32> to vector<16x8xbf16>
    %c0_42 = arith.constant 0 : index
    %c3 = arith.constant 3 : index
    %c0_43 = arith.constant 0 : index
    %c0_44 = arith.constant 0 : index
    %129 = vector.load %arg9[%c0_42, %c3, %c0_43, %c0_44] : memref<1x4x8x32xbf16, #tpu.memory_space<vmem>>, vector<1x1x8x32xbf16>
    %130 = vector.shape_cast %129 : vector<1x1x8x32xbf16> to vector<8x32xbf16>
    %cst_45 = arith.constant dense<0.000000e+00> : vector<16x32xf32>
    %131 = tpu.matmul %128, %130, %cst_45 {dimension_numbers = #tpu.dot_dimension_numbers<[1], [0], [0], [1], [0, 0, 1, 1], [], []>} : vector<16x8xbf16>, vector<8x32xbf16>, vector<16x32xf32> -> vector<16x32xf32>
    %132 = arith.addf %102, %131 : vector<16x32xf32>
    %c0_46 = arith.constant 0 : index
    %c0_47 = arith.constant 0 : index
    %c0_48 = arith.constant 0 : index
    %133 = vector.load %arg10[%c0_46, %c0_47, %c0_48] : memref<1x1x32xf32, #tpu.memory_space<vmem>>, vector<1x1x32xf32>
    %134 = vector.shape_cast %133 : vector<1x1x32xf32> to vector<1x32xf32>
    %135 = vector.broadcast %134 : vector<1x32xf32> to vector<16x32xf32>
    %136 = arith.addf %132, %135 : vector<16x32xf32>
    %137 = arith.addf %136, %3 : vector<16x32xf32>
    %c0_49 = arith.constant 0 : index
    %c0_50 = arith.constant 0 : index
    %c0_51 = arith.constant 0 : index
    %138 = vector.load %arg11[%c0_49, %c0_50, %c0_51] : memref<1x1x32xf32, #tpu.memory_space<vmem>>, vector<1x1x32xf32>
    %139 = vector.shape_cast %138 : vector<1x1x32xf32> to vector<1x32xf32>
    %c0_52 = arith.constant 0 : index
    %c0_53 = arith.constant 0 : index
    %c0_54 = arith.constant 0 : index
    %140 = vector.load %arg12[%c0_52, %c0_53, %c0_54] : memref<1x1x32xf32, #tpu.memory_space<vmem>>, vector<1x1x32xf32>
    %141 = vector.shape_cast %140 : vector<1x1x32xf32> to vector<1x32xf32>
    %cst_55 = arith.constant dense<0.000000e+00> : vector<16xf32>
    %142 = vector.multi_reduction <add>, %137, %cst_55 [1] : vector<16x32xf32> to vector<16xf32>
    %143 = vector.shape_cast %142 : vector<16xf32> to vector<16x1xf32>
    %cst_56 = arith.constant 3.200000e+01 : f32
    %144 = vector.broadcast %cst_56 : f32 to vector<16x1xf32>
    %145 = arith.divf %143, %144 : vector<16x1xf32>
    %146 = vector.broadcast %145 : vector<16x1xf32> to vector<16x32xf32>
    %147 = arith.subf %137, %146 : vector<16x32xf32>
    %148 = arith.mulf %147, %147 : vector<16x32xf32>
    %cst_57 = arith.constant dense<0.000000e+00> : vector<16xf32>
    %149 = vector.multi_reduction <add>, %148, %cst_57 [1] : vector<16x32xf32> to vector<16xf32>
    %150 = vector.shape_cast %149 : vector<16xf32> to vector<16x1xf32>
    %cst_58 = arith.constant 3.200000e+01 : f32
    %151 = vector.broadcast %cst_58 : f32 to vector<16x1xf32>
    %152 = arith.divf %150, %151 : vector<16x1xf32>
    %cst_59 = arith.constant 9.99999974E-6 : f32
    %153 = vector.broadcast %cst_59 : f32 to vector<16x1xf32>
    %154 = arith.addf %152, %153 : vector<16x1xf32>
    %155 = math.rsqrt %154 : vector<16x1xf32>
    %156 = vector.broadcast %155 : vector<16x1xf32> to vector<16x32xf32>
    %157 = arith.mulf %147, %156 : vector<16x32xf32>
    %158 = vector.broadcast %139 : vector<1x32xf32> to vector<16x32xf32>
    %159 = arith.mulf %157, %158 : vector<16x32xf32>
    %160 = vector.broadcast %141 : vector<1x32xf32> to vector<16x32xf32>
    %161 = arith.addf %159, %160 : vector<16x32xf32>
    %162 = arith.truncf %161 : vector<16x32xf32> to vector<16x32xbf16>
    %c0_60 = arith.constant 0 : index
    %c0_61 = arith.constant 0 : index
    %c0_62 = arith.constant 0 : index
    %163 = vector.load %arg13[%c0_60, %c0_61, %c0_62] : memref<1x32x64xbf16, #tpu.memory_space<vmem>>, vector<1x32x64xbf16>
    %164 = vector.shape_cast %163 : vector<1x32x64xbf16> to vector<32x64xbf16>
    %cst_63 = arith.constant dense<0.000000e+00> : vector<16x64xf32>
    %165 = tpu.matmul %162, %164, %cst_63 {dimension_numbers = #tpu.dot_dimension_numbers<[1], [0], [0], [1], [0, 0, 1, 1], [], []>} : vector<16x32xbf16>, vector<32x64xbf16>, vector<16x64xf32> -> vector<16x64xf32>
    %c0_64 = arith.constant 0 : index
    %c0_65 = arith.constant 0 : index
    %c0_66 = arith.constant 0 : index
    %166 = vector.load %arg14[%c0_64, %c0_65, %c0_66] : memref<1x1x64xf32, #tpu.memory_space<vmem>>, vector<1x1x64xf32>
    %167 = vector.shape_cast %166 : vector<1x1x64xf32> to vector<1x64xf32>
    %168 = vector.broadcast %167 : vector<1x64xf32> to vector<16x64xf32>
    %169 = arith.addf %165, %168 : vector<16x64xf32>
    %cst_67 = arith.constant 0.000000e+00 : f32
    %170 = vector.broadcast %cst_67 : f32 to vector<16x64xf32>
    %171 = arith.maximumf %169, %170 : vector<16x64xf32>
    %172 = arith.truncf %171 : vector<16x64xf32> to vector<16x64xbf16>
    %c0_68 = arith.constant 0 : index
    %c0_69 = arith.constant 0 : index
    %c0_70 = arith.constant 0 : index
    %173 = vector.load %arg15[%c0_68, %c0_69, %c0_70] : memref<1x64x32xbf16, #tpu.memory_space<vmem>>, vector<1x64x32xbf16>
    %174 = vector.shape_cast %173 : vector<1x64x32xbf16> to vector<64x32xbf16>
    %cst_71 = arith.constant dense<0.000000e+00> : vector<16x32xf32>
    %175 = tpu.matmul %172, %174, %cst_71 {dimension_numbers = #tpu.dot_dimension_numbers<[1], [0], [0], [1], [0, 0, 1, 1], [], []>} : vector<16x64xbf16>, vector<64x32xbf16>, vector<16x32xf32> -> vector<16x32xf32>
    %c0_72 = arith.constant 0 : index
    %c0_73 = arith.constant 0 : index
    %c0_74 = arith.constant 0 : index
    %176 = vector.load %arg16[%c0_72, %c0_73, %c0_74] : memref<1x1x32xf32, #tpu.memory_space<vmem>>, vector<1x1x32xf32>
    %177 = vector.shape_cast %176 : vector<1x1x32xf32> to vector<1x32xf32>
    %178 = vector.broadcast %177 : vector<1x32xf32> to vector<16x32xf32>
    %179 = arith.addf %175, %178 : vector<16x32xf32>
    %180 = arith.addf %179, %161 : vector<16x32xf32>
    %c0_75 = arith.constant 0 : index
    %c0_76 = arith.constant 0 : index
    %c0_77 = arith.constant 0 : index
    %181 = vector.load %arg17[%c0_75, %c0_76, %c0_77] : memref<1x1x32xf32, #tpu.memory_space<vmem>>, vector<1x1x32xf32>
    %182 = vector.shape_cast %181 : vector<1x1x32xf32> to vector<1x32xf32>
    %c0_78 = arith.constant 0 : index
    %c0_79 = arith.constant 0 : index
    %c0_80 = arith.constant 0 : index
    %183 = vector.load %arg18[%c0_78, %c0_79, %c0_80] : memref<1x1x32xf32, #tpu.memory_space<vmem>>, vector<1x1x32xf32>
    %184 = vector.shape_cast %183 : vector<1x1x32xf32> to vector<1x32xf32>
    %cst_81 = arith.constant dense<0.000000e+00> : vector<16xf32>
    %185 = vector.multi_reduction <add>, %180, %cst_81 [1] : vector<16x32xf32> to vector<16xf32>
    %186 = vector.shape_cast %185 : vector<16xf32> to vector<16x1xf32>
    %cst_82 = arith.constant 3.200000e+01 : f32
    %187 = vector.broadcast %cst_82 : f32 to vector<16x1xf32>
    %188 = arith.divf %186, %187 : vector<16x1xf32>
    %189 = vector.broadcast %188 : vector<16x1xf32> to vector<16x32xf32>
    %190 = arith.subf %180, %189 : vector<16x32xf32>
    %191 = arith.mulf %190, %190 : vector<16x32xf32>
    %cst_83 = arith.constant dense<0.000000e+00> : vector<16xf32>
    %192 = vector.multi_reduction <add>, %191, %cst_83 [1] : vector<16x32xf32> to vector<16xf32>
    %193 = vector.shape_cast %192 : vector<16xf32> to vector<16x1xf32>
    %cst_84 = arith.constant 3.200000e+01 : f32
    %194 = vector.broadcast %cst_84 : f32 to vector<16x1xf32>
    %195 = arith.divf %193, %194 : vector<16x1xf32>
    %cst_85 = arith.constant 9.99999974E-6 : f32
    %196 = vector.broadcast %cst_85 : f32 to vector<16x1xf32>
    %197 = arith.addf %195, %196 : vector<16x1xf32>
    %198 = math.rsqrt %197 : vector<16x1xf32>
    %199 = vector.broadcast %198 : vector<16x1xf32> to vector<16x32xf32>
    %200 = arith.mulf %190, %199 : vector<16x32xf32>
    %201 = vector.broadcast %182 : vector<1x32xf32> to vector<16x32xf32>
    %202 = arith.mulf %200, %201 : vector<16x32xf32>
    %203 = vector.broadcast %184 : vector<1x32xf32> to vector<16x32xf32>
    %204 = arith.addf %202, %203 : vector<16x32xf32>
    %c0_86 = arith.constant 0 : index
    %c0_87 = arith.constant 0 : index
    %205 = vector.load %arg22[%c0_86, %c0_87] : memref<16x32xf32, #tpu.memory_space<vmem>>, vector<16x32xf32>
    tpu.vector_store %arg22[%c0_86, %c0_87], %204 {strides = array<i32>} : memref<16x32xf32, #tpu.memory_space<vmem>>, vector<16x32xf32>,
    %c1_i32 = arith.constant 1 : i32
    %206 = arith.cmpi eq, %arg1, %c1_i32 : i32
    %207 = arith.extui %206 : i1 to i32
    %c0_i32_88 = arith.constant 0 : i32
    %208 = arith.cmpi ne, %207, %c0_i32_88 : i32
    scf.if %208 {
      %209 = arith.truncf %204 : vector<16x32xf32> to vector<16x32xbf16>
      %c0_89 = arith.constant 0 : index
      %c0_90 = arith.constant 0 : index
      %210 = vector.load %arg19[%c0_89, %c0_90] : memref<32x128xbf16, #tpu.memory_space<vmem>>, vector<32x128xbf16>
      %cst_91 = arith.constant dense<0.000000e+00> : vector<16x128xf32>
      %211 = tpu.matmul %209, %210, %cst_91 {dimension_numbers = #tpu.dot_dimension_numbers<[1], [0], [0], [1], [0, 0, 1, 1], [], []>} : vector<16x32xbf16>, vector<32x128xbf16>, vector<16x128xf32> -> vector<16x128xf32>
      %c0_92 = arith.constant 0 : index
      %c0_93 = arith.constant 0 : index
      %212 = vector.load %arg20[%c0_92, %c0_93] : memref<1x128xf32, #tpu.memory_space<vmem>>, vector<1x128xf32>
      %213 = vector.broadcast %212 : vector<1x128xf32> to vector<16x128xf32>
      %214 = arith.addf %211, %213 : vector<16x128xf32>
      %215 = vector.shape_cast %214 : vector<16x128xf32> to vector<2x8x128xf32>
      %c0_94 = arith.constant 0 : index
      %c0_95 = arith.constant 0 : index
      %c0_96 = arith.constant 0 : index
      %216 = vector.load %arg21[%c0_94, %c0_95, %c0_96] : memref<2x8x128xf32, #tpu.memory_space<vmem>>, vector<2x8x128xf32>
      tpu.vector_store %arg21[%c0_94, %c0_95, %c0_96], %215 {strides = array<i32>} : memref<2x8x128xf32, #tpu.memory_space<vmem>>, vector<2x8x128xf32>,
    } else {
    }
    return
  }
  func.func @transform_0(%arg0: i32, %arg1: i32) -> (i32, i32, i32) {
    %c0_i32 = arith.constant 0 : i32
    %c0_i32_0 = arith.constant 0 : i32
    %c0_i32_1 = arith.constant 0 : i32
    return %arg0, %c0_i32, %c0_i32_0 : i32, i32, i32
  }
  func.func @transform_1(%arg0: i32, %arg1: i32) -> (i32, i32) {
    %c0_i32 = arith.constant 0 : i32
    %c0_i32_0 = arith.constant 0 : i32
    %c0_i32_1 = arith.constant 0 : i32
    return %c0_i32, %c0_i32_0 : i32, i32
  }
  func.func @transform_2(%arg0: i32, %arg1: i32) -> (i32, i32) {
    %c0_i32 = arith.constant 0 : i32
    %c0_i32_0 = arith.constant 0 : i32
    %c0_i32_1 = arith.constant 0 : i32
    return %c0_i32, %c0_i32_0 : i32, i32
  }
  func.func @transform_3(%arg0: i32, %arg1: i32) -> (i32, i32) {
    %c0_i32 = arith.constant 0 : i32
    %c0_i32_0 = arith.constant 0 : i32
    %c0_i32_1 = arith.constant 0 : i32
    return %c0_i32, %c0_i32_0 : i32, i32
  }
  func.func @transform_4(%arg0: i32, %arg1: i32) -> (i32, i32) {
    %c0_i32 = arith.constant 0 : i32
    %c0_i32_0 = arith.constant 0 : i32
    %c0_i32_1 = arith.constant 0 : i32
    return %c0_i32, %c0_i32_0 : i32, i32
  }
  func.func @transform_5(%arg0: i32, %arg1: i32) -> (i32, i32, i32) {
    %c0_i32 = arith.constant 0 : i32
    %c0_i32_0 = arith.constant 0 : i32
    %c0_i32_1 = arith.constant 0 : i32
    return %arg1, %c0_i32, %c0_i32_0 : i32, i32, i32
  }
  func.func @transform_6(%arg0: i32, %arg1: i32) -> (i32, i32, i32) {
    %c0_i32 = arith.constant 0 : i32
    %c0_i32_0 = arith.constant 0 : i32
    %c0_i32_1 = arith.constant 0 : i32
    return %arg1, %c0_i32, %c0_i32_0 : i32, i32, i32
  }
  func.func @transform_7(%arg0: i32, %arg1: i32) -> (i32, i32, i32, i32) {
    %c0_i32 = arith.constant 0 : i32
    %c0_i32_0 = arith.constant 0 : i32
    %c0_i32_1 = arith.constant 0 : i32
    %c0_i32_2 = arith.constant 0 : i32
    return %arg1, %c0_i32, %c0_i32_0, %c0_i32_1 : i32, i32, i32, i32
  }
  func.func @transform_8(%arg0: i32, %arg1: i32) -> (i32, i32, i32) {
    %c0_i32 = arith.constant 0 : i32
    %c0_i32_0 = arith.constant 0 : i32
    %c0_i32_1 = arith.constant 0 : i32
    return %arg1, %c0_i32, %c0_i32_0 : i32, i32, i32
  }
  func.func @transform_9(%arg0: i32, %arg1: i32) -> (i32, i32, i32) {
    %c0_i32 = arith.constant 0 : i32
    %c0_i32_0 = arith.constant 0 : i32
    %c0_i32_1 = arith.constant 0 : i32
    return %arg1, %c0_i32, %c0_i32_0 : i32, i32, i32
  }
  func.func @transform_10(%arg0: i32, %arg1: i32) -> (i32, i32, i32) {
    %c0_i32 = arith.constant 0 : i32
    %c0_i32_0 = arith.constant 0 : i32
    %c0_i32_1 = arith.constant 0 : i32
    return %arg1, %c0_i32, %c0_i32_0 : i32, i32, i32
  }
  func.func @transform_11(%arg0: i32, %arg1: i32) -> (i32, i32, i32) {
    %c0_i32 = arith.constant 0 : i32
    %c0_i32_0 = arith.constant 0 : i32
    %c0_i32_1 = arith.constant 0 : i32
    return %arg1, %c0_i32, %c0_i32_0 : i32, i32, i32
  }
  func.func @transform_12(%arg0: i32, %arg1: i32) -> (i32, i32, i32) {
    %c0_i32 = arith.constant 0 : i32
    %c0_i32_0 = arith.constant 0 : i32
    %c0_i32_1 = arith.constant 0 : i32
    return %arg1, %c0_i32, %c0_i32_0 : i32, i32, i32
  }
  func.func @transform_13(%arg0: i32, %arg1: i32) -> (i32, i32, i32) {
    %c0_i32 = arith.constant 0 : i32
    %c0_i32_0 = arith.constant 0 : i32
    %c0_i32_1 = arith.constant 0 : i32
    return %arg1, %c0_i32, %c0_i32_0 : i32, i32, i32
  }
  func.func @transform_14(%arg0: i32, %arg1: i32) -> (i32, i32, i32) {
    %c0_i32 = arith.constant 0 : i32
    %c0_i32_0 = arith.constant 0 : i32
    %c0_i32_1 = arith.constant 0 : i32
    return %arg1, %c0_i32, %c0_i32_0 : i32, i32, i32
  }
  func.func @transform_15(%arg0: i32, %arg1: i32) -> (i32, i32, i32) {
    %c0_i32 = arith.constant 0 : i32
    %c0_i32_0 = arith.constant 0 : i32
    %c0_i32_1 = arith.constant 0 : i32
    return %arg1, %c0_i32, %c0_i32_0 : i32, i32, i32
  }
  func.func @transform_16(%arg0: i32, %arg1: i32) -> (i32, i32, i32) {
    %c0_i32 = arith.constant 0 : i32
    %c0_i32_0 = arith.constant 0 : i32
    %c0_i32_1 = arith.constant 0 : i32
    return %arg1, %c0_i32, %c0_i32_0 : i32, i32, i32
  }
  func.func @transform_17(%arg0: i32, %arg1: i32) -> (i32, i32) {
    %c0_i32 = arith.constant 0 : i32
    %c0_i32_0 = arith.constant 0 : i32
    %c0_i32_1 = arith.constant 0 : i32
    return %c0_i32, %c0_i32_0 : i32, i32
  }
  func.func @transform_18(%arg0: i32, %arg1: i32) -> (i32, i32) {
    %c0_i32 = arith.constant 0 : i32
    %c0_i32_0 = arith.constant 0 : i32
    %c0_i32_1 = arith.constant 0 : i32
    return %c0_i32, %c0_i32_0 : i32, i32
  }
  func.func @transform_19(%arg0: i32, %arg1: i32) -> (i32, i32, i32) {
    %c0_i32 = arith.constant 0 : i32
    %c0_i32_0 = arith.constant 0 : i32
    %c0_i32_1 = arith.constant 0 : i32
    return %arg0, %c0_i32, %c0_i32_0 : i32, i32, i32
  }
}

</mosaic_0001>

<bundles_post_ra>
// kernel: tpu_custom_call.1
= control target key start
LH: loop header
LB: loop body
LE: loop exit
PB: predicated region body
PF: predicated region fallthrough
CT: control target
= control target key end

     0   :  { %s4487_s0 = inlined_call_operand.hbm [shape: f32[2,8,16], index: 0, kind: input, shape index: {}]   ;;  %s4488_s1 = inlined_call_operand.hbm [shape: bf16[16,32], index: 1, kind: input, shape index: {}]   ;;  %s4489_s2 = inlined_call_operand.vmem [shape: f32[1,32], index: 2, kind: input, shape index: {}]   ;;  %s4490_s3 = inlined_call_operand.hbm [shape: bf16[32,32], index: 3, kind: input, shape index: {}]   ;;  %s4491_s4 = inlined_call_operand.hbm [shape: f32[1,32], index: 4, kind: input, shape index: {}]   ;;  %s4492_s5 = inlined_call_operand.vmem [shape: bf16[2,32,96], index: 5, kind: input, shape index: {}]   ;;  %s4493_s6 = inlined_call_operand.hbm [shape: f32[2,1,96], index: 6, kind: input, shape index: {}]   ;;  %s4494_s7 = inlined_call_operand.vmem [shape: bf16[2,4,8,32], index: 7, kind: input, shape index: {}]   ;;  %s4495_s8 = inlined_call_operand.hbm [shape: f32[2,1,32], index: 8, kind: input, shape index: {}]   ;;  %s4496_s9 = inlined_call_operand.hbm [shape: f32[2,1,32], index: 9, kind: input, shape index: {}]   ;;  %s4497_s10 = inlined_call_operand.hbm [shape: f32[2,1,32], index: 10, kind: input, shape index: {}]   ;;  %s4498_s11 = inlined_call_operand.vmem [shape: bf16[2,32,64], index: 11, kind: input, shape index: {}]   ;;  %s4499_s12 = inlined_call_operand.hbm [shape: f32[2,1,64], index: 12, kind: input, shape index: {}]   ;;  %s4500_s13 = inlined_call_operand.vmem [shape: bf16[2,64,32], index: 13, kind: input, shape index: {}]   ;;  %s4501_s14 = inlined_call_operand.vmem [shape: f32[2,1,32], index: 14, kind: input, shape index: {}]   ;;  %s4502_s15 = inlined_call_operand.vmem [shape: f32[2,1,32], index: 15, kind: input, shape index: {}]   ;;  %s4503_s16 = inlined_call_operand.vmem [shape: f32[2,1,32], index: 16, kind: input, shape index: {}]   ;;  %s4504_s17 = inlined_call_operand.vmem [shape: bf16[32,128], index: 17, kind: input, shape index: {}]   ;;  %s4505_s18 = inlined_call_operand.vmem [shape: f32[1,128], index: 18, kind: input, shape index: {}]   ;;  %s4506_s19 = inlined_call_operand.hbm [shape: f32[2,8,128], index: 19, kind: output, shape index: {}]  }
   0x1   :  { %4533 = sst [smem:[#allocation27_spill]] %s4487_s0 }
   0x2   :  { %4534 = sst [smem:[#allocation28_spill]] %s4488_s1 }
   0x3   :  { %4535 = sst [smem:[#allocation29_spill]] %s4489_s2 }
   0x4   :  { %4536 = sst [smem:[#allocation30_spill]] %s4490_s3 }
   0x5   :  { %4537 = sst [smem:[#allocation31_spill]] %s4491_s4 }
   0x6   :  { %4538 = sst [smem:[#allocation32_spill]] %s4492_s5 }
   0x7   :  { %4539 = sst [smem:[#allocation33_spill]] %s4493_s6 }
   0x8   :  { %4540 = sst [smem:[#allocation34_spill]] %s4494_s7 }
   0x9   :  { %4541 = sst [smem:[#allocation35_spill]] %s4495_s8 }
   0xa   :  { %4542 = sst [smem:[#allocation36_spill]] %s4496_s9 }
   0xb   :  { %4543 = sst [smem:[#allocation37_spill]] %s4497_s10 }
   0xc   :  { %4544 = sst [smem:[#allocation38_spill]] %s4498_s11 }
   0xd   :  { %4545 = sst [smem:[#allocation39_spill]] %s4500_s13 }
   0xe   :  { %4546 = sst [smem:[#allocation40_spill]] %s4501_s14 }
   0xf   :  { %4547 = sst [smem:[#allocation41_spill]] %s4502_s15 }
  0x10   :  { %4548 = sst [smem:[#allocation42_spill]] %s4503_s16 }
  0x11   :  { %4549 = sst [smem:[#allocation43_spill]] %s4504_s17 }
  0x12   :  { %4550 = sst [smem:[#allocation44_spill]] %s4505_s18 }
  0x13   :  { %4551 = sst [smem:[#allocation45_spill]] %s4506_s19 }
  0x14   :  { %24 = vsyncpa [#allocation4], 0 }
  0x15   :  { %25 = vsyncpa [#allocation7], 0 }
  0x16   :  { %26 = vsyncpa [#allocation10], 0 }
  0x17   :  { %27 = vsyncpa [#allocation5], 0  ;;  %s3826_s0 = smov 0   ;;  %s3828_s30 = smov 0  }
  0x18   :  { %s3830_s20 = smov 0   ;;  %s3832_s21 = smov 0  }
  0x19   :  { %s3834_s1 = smov 0   ;;  %s3836_s22 = smov 0  }
  0x1a LB: > { %4552 = sst [smem:[#allocation22_spill]] %s3679_s20  ;;  %s3855_s2 = sadd.s32 4294967295, %s3691_s22   ;;  %s3691_s22 = sphi %s3836_s22, %s33_s22   ;;  %s3687_s1 = sphi %s3834_s1, %s4610_s1   ;;  %s3683_s21 = sphi %s3832_s21, %s4609_s21   ;;  %s3679_s20 = sphi %s3830_s20, %s4613_s20   ;;  %s3675_s30 = sphi %s3828_s30, %s4612_s30   ;;  %s3671_s0 = sphi %s3826_s0, %s4611_s0  }
  0x1b   : > { %4553 = sst [smem:[#allocation23_spill]] %s3687_s1  ;;  %p201_p0 = scmp.ne.s32.totalorder %s3675_s30, %s3671_s0 }
  0x1c   : > { %4554 = sst [smem:[#allocation24_spill]] %s3691_s22  ;;  %p4512_p1 = scmp.eq.s32.totalorder %s3855_s2, 0 }
  0x1d   : > { %p2822_p2 = scmp.ge.s32.totalorder %s3691_s22, 1  ;;  %p540_p3 = scmp.lt.s32.totalorder %s3691_s22, 3 }
  0x1e   : > { %p3863_p4 = por %p4512_p1, %p201_p0  ;;  %s3693_s25 = smov [#allocation3]  }
  0x1f   : > { %p3867_p5 = pnand %p2822_p2, %p540_p3  ;;  %s555_s3 = sshll.u32 %s3693_s25, 4  ;;  %s556_s3 = int_to_ptr.vmem [resolvable:$true] %s555_s3 }
  0x20   : > { %s4555_s23 = scalar_select %p3863_p4, 1, 0 }
  0x21   : > { %s4556_s24 = scalar_select %p3867_p5, 1, 0 }
  0x22   : > { %p3168_p6 = pneg %p3867_p5  ;;  %s42_s27 = sadd.s32 1, %s3687_s1 }
  0x23   : > { %s4558_s0 = sld [smem:[#allocation27_spill]] }
  0x24   : > { %p3875_p7 = pnand %p3168_p6, %p4512_p1 }
  0x26   : > { %s4557_s26 = scalar_select %p3875_p7, 1, 0 }
  0x27   : > { %p3888_p9 = pneg %p3875_p7 }
  0x29   : > { %s4559_s19 = smov %s4558_s0  ;;  %s3337_s18 = scalar_lea.hbm %s4558_s0, 256 }
  0x2a   : > { %p3338_p8 = scmp.ne.s32.totalorder %s4559_s19, %s3337_s18  ;;  %p3344_p12 = scmp.lt.u32.totalorder %s3337_s18, %s4559_s19 }
  0x2b   : > { %s4560_s25 = scalar_select %p3888_p9, 1, 0 }
  0x2c   : > { %p3340_p10 = pnand %p3888_p9, %p3338_p8 }
  0x2e   : > { %p3341_p11 = pneg %p3340_p10 }
  0x30   : > { %p3346_p13 = pnand %p3344_p12, %p3341_p11 }
  0x32   : > { %3349 = shalt.err (!%p3346_p13)
}
  0x33   : > { %s3350_s28 = scalar_lea.vmem %s556_s3, 256  ;;  %p3358_p6 = scmp.lt.s32.totalorder %s556_s3, %s556_s3 }
  0x34   : > { %p3351_p0 = scmp.ne.s32.totalorder %s556_s3, %s3350_s28  ;;  %p3359_p1 = scmp.lt.s32.totalorder %s3350_s28, %s3350_s28 }
  0x36   : > { %p3353_p2 = pnand %p3351_p0, %p3888_p9  ;;  %p3360_p4 = por %p3359_p1, %p3358_p6 }
  0x38   : > { %p3354_p3 = pneg %p3353_p2 }
  0x3a   : > { %p3361_p5 = pnand %p3360_p4, %p3354_p3 }
  0x3c   : > { %3364 = shalt.err (!%p3361_p5)
}
  0x3d   : > { %s3694_s16 = smov 128   ;;  %s3695_s14 = smov 8  }
  0x3e   : > { %3171 = dma.hbm_to_vmem [thread:$0]  (!%p3875_p7), %s4559_s19, 256, %s556_s3, [#allocation4], %s3694_s16, %s3694_s16, %s3695_s14  }
  0x3f   : > { %p43_p1 = scmp.ge.s32.totalorder %s42_s27, 2  ;;  %s188_s18 = sadd.s32 1, %s3679_s20 }
  0x40   : > { %p195_p4 = scmp.ne.s32.totalorder %s3679_s20, %s3675_s30  ;;  %p196_p5 = scmp.eq.s32.totalorder %s3691_s22, 0 }
  0x41   : > { %s4615_s27 = smov (%p43_p1, %s42_s27), 0  ;;  %p3201_p10 = scmp.lt.s32.totalorder %s3691_s22, 2 }
  0x42   : > { %4561 = sst [smem:[#allocation25_spill]] %s4615_s27  ;;  %p197_p8 = por %p196_p5, %p195_p4 }
  0x43   : > { %s185_s29 = ssub.s32 %s3687_s1, %s4615_s27  ;;  %s623_s0 = sand.u32 1, %s3691_s22  }
  0x44   : > { %p186_p11 = scmp.eq.s32.totalorder %s185_s29, 0  ;;  %s3915_s28 = sand.u32 1, %s3679_s20  }
  0x45   : > { %s3918_s13 = sshll.u32 %s3687_s1, 4  ;;  %s4563_s6 = sld [smem:[#allocation33_spill]] }
  0x46   : > { %s3921_s3 = scalar_select %p186_p11, %s3679_s20, %s188_s18  }
  0x47   : > { %s626_s17 = scalar_lea.vmem [#allocation11], %s3915_s28  ;;  %p3930_p12 = pnand %p3201_p10, %p197_p8 }
  0x48   : > { %4562 = sst [smem:[#allocation26_spill]] %s3921_s3  ;;  %s633_s29 = sshll.u32 %s626_s17, 4  ;;  %s3934_s29 = int_to_ptr.vmem [resolvable:$true] %s633_s29 }
  0x49   : > { %s4564_s19 = scalar_select %p3930_p12, 1, 0 }
  0x4a   : > { %s4565_s8 = sld [smem:[#allocation35_spill]]  ;;  %s3942_s16 = scalar_lea.sflag [#allocation4], %s623_s0 }
  0x4b   : > { %s3927_s15 = scalar_lea.hbm %s4563_s6, %s3918_s13  ;;  %p3948_p0 = pneg %p3930_p12 }
  0x4c   : > { %s3365_s14 = scalar_lea.hbm %s3927_s15, 16  ;;  %s3370_s22 = scalar_lea.hbm %s4563_s6, 32 }
  0x4d   : > { %p3366_p13 = scmp.ne.s32.totalorder %s3927_s15, %s3365_s14  ;;  %p3371_p6 = scmp.lt.u32.totalorder %s3927_s15, %s4563_s6 }
  0x4e   : > { %s4566_s3 = scalar_select %p3948_p0, 1, 0 }
  0x4f   : > { %p3368_p2 = pnand %p3948_p0, %p3366_p13  ;;  %p3372_p1 = scmp.lt.u32.totalorder %s3370_s22, %s3365_s14 }
  0x50   : > { %s3940_s1 = scalar_lea.hbm %s4565_s8, %s3918_s13  ;;  %p3374_p5 = scmp.lt.u32.totalorder %s3365_s14, %s3927_s15 }
  0x51   : > { %p3369_p3 = pneg %p3368_p2  ;;  %p3373_p4 = por %p3372_p1, %p3371_p6 }
  0x53   : > { %p3375_p8 = por %p3374_p5, %p3373_p4 }
  0x55   : > { %p3376_p10 = pnand %p3375_p8, %p3369_p3 }
  0x57   : > { %3379 = shalt.err (!%p3376_p10)
}
  0x58   : > { %s3380_s0 = scalar_lea.vmem %s3934_s29, 16  ;;  %s3696_s20 = smov [#allocation11]  }
  0x59   : > { %p3381_p11 = scmp.ne.s32.totalorder %s3934_s29, %s3380_s0  ;;  %s3385_s17 = sshll.u32 %s3696_s20, 4  ;;  %s3386_s17 = int_to_ptr.vmem [resolvable:$false] %s3385_s17 }
  0x5a   : > { %s3387_s27 = scalar_lea.vmem %s3386_s17, 32  ;;  %p3388_p7 = scmp.lt.s32.totalorder %s3934_s29, %s3386_s17 }
  0x5b   : > { %p3383_p13 = pnand %p3381_p11, %p3948_p0  ;;  %p3389_p9 = scmp.lt.s32.totalorder %s3387_s27, %s3380_s0 }
  0x5d   : > { %p3384_p2 = pneg %p3383_p13  ;;  %p3390_p6 = por %p3389_p9, %p3388_p7 }
  0x5f   : > { %p3391_p1 = pnand %p3390_p6, %p3384_p2 }
  0x61   : > { %3394 = shalt.err (!%p3391_p1)
}
  0x62   : > { %3184 = dma.hbm_to_vmem [thread:$0]  (!%p3930_p12), %s3927_s15, 16, %s3934_s29, %s3942_s16  }
  0x63   : > { %s651_s22 = scalar_lea.vmem [#allocation12], %s3915_s28  ;;  %s4567_s9 = sld [smem:[#allocation36_spill]] }
  0x64   : > { %s658_s14 = sshll.u32 %s651_s22, 4  ;;  %s3395_s17 = scalar_lea.hbm %s3940_s1, 16  ;;  %s659_s14 = int_to_ptr.vmem [resolvable:$true] %s658_s14 }
  0x65   : > { %p3396_p7 = scmp.ne.s32.totalorder %s3940_s1, %s3395_s17  ;;  %s3400_s11 = scalar_lea.hbm %s4565_s8, 32 }
  0x66   : > { %p3401_p4 = scmp.lt.u32.totalorder %s3940_s1, %s4565_s8  ;;  %p3402_p5 = scmp.lt.u32.totalorder %s3400_s11, %s3395_s17 }
  0x67   : > { %p3398_p9 = pnand %p3396_p7, %p3948_p0  ;;  %p3404_p10 = scmp.lt.u32.totalorder %s3395_s17, %s3940_s1 }
  0x68   : > { %p3403_p8 = por %p3402_p5, %p3401_p4 }
  0x69   : > { %s3977_s20 = scalar_lea.hbm %s4567_s9, %s3918_s13  ;;  %p3399_p3 = pneg %p3398_p9 }
  0x6a   : > { %p3405_p11 = por %p3404_p10, %p3403_p8 }
  0x6c   : > { %p3406_p13 = pnand %p3405_p11, %p3399_p3 }
  0x6e   : > { %3409 = shalt.err (!%p3406_p13)
}
  0x6f   : > { %s3410_s15 = scalar_lea.vmem %s659_s14, 16  ;;  %s3697_s29 = smov [#allocation12]  }
  0x70   : > { %p3411_p2 = scmp.ne.s32.totalorder %s659_s14, %s3410_s15  ;;  %s3415_s22 = sshll.u32 %s3697_s29, 4  ;;  %s3416_s22 = int_to_ptr.vmem [resolvable:$false] %s3415_s22 }
  0x71   : > { %s3417_s6 = scalar_lea.vmem %s3416_s22, 32  ;;  %p3418_p7 = scmp.lt.s32.totalorder %s659_s14, %s3416_s22 }
  0x72   : > { %p3413_p6 = pnand %p3411_p2, %p3948_p0  ;;  %p3419_p9 = scmp.lt.s32.totalorder %s3417_s6, %s3410_s15 }
  0x74   : > { %p3414_p1 = pneg %p3413_p6  ;;  %p3420_p12 = por %p3419_p9, %p3418_p7 }
  0x76   : > { %p3421_p4 = pnand %p3420_p12, %p3414_p1 }
  0x78   : > { %3424 = shalt.err (!%p3421_p4)
}
  0x79   : > { %p4568_p5 = scmp.ne.s32.totalorder %s4564_s19, 0  ;;  %s668_s5 = scalar_lea.vmem [#allocation13], %s3915_s28 }
  0x7a   : > { %s675_s7 = sshll.u32 %s668_s5, 4  ;;  %s3698_s11 = smov [#allocation6]   ;;  %s3998_s7 = int_to_ptr.vmem [resolvable:$true] %s675_s7 }
  0x7b   : > { %3187 = dma.hbm_to_vmem [thread:$0]  (!%p4568_p5), %s3940_s1, 16, %s659_s14, %s3942_s16  }
  0x7c   : > { %s568_s18 = sshll.u32 %s3698_s11, 4  ;;  %s3425_s0 = scalar_lea.hbm %s3977_s20, 16  ;;  %s569_s18 = int_to_ptr.vmem [resolvable:$true] %s568_s18 }
  0x7d   : > { %p3426_p12 = scmp.ne.s32.totalorder %s3977_s20, %s3425_s0  ;;  %s3430_s15 = scalar_lea.hbm %s4567_s9, 32 }
  0x7e   : > { %p3431_p10 = scmp.lt.u32.totalorder %s3977_s20, %s4567_s9  ;;  %p3432_p11 = scmp.lt.u32.totalorder %s3430_s15, %s3425_s0 }
  0x7f   : > { %p3428_p3 = pnand %p3426_p12, %p3948_p0  ;;  %p3434_p2 = scmp.lt.u32.totalorder %s3425_s0, %s3977_s20 }
  0x80   : > { %p3433_p13 = por %p3432_p11, %p3431_p10 }
  0x81   : > { %p3429_p8 = pneg %p3428_p3 }
  0x82   : > { %p3435_p6 = por %p3434_p2, %p3433_p13 }
  0x84   : > { %p3436_p1 = pnand %p3435_p6, %p3429_p8 }
  0x86   : > { %3439 = shalt.err (!%p3436_p1)
}
  0x87   : > { %s3440_s1 = scalar_lea.vmem %s3998_s7, 16  ;;  %s3699_s14 = smov [#allocation13]  }
  0x88   : > { %p3441_p7 = scmp.ne.s32.totalorder %s3998_s7, %s3440_s1  ;;  %s3445_s6 = sshll.u32 %s3699_s14, 4  ;;  %s3446_s6 = int_to_ptr.vmem [resolvable:$false] %s3445_s6 }
  0x89   : > { %s3447_s5 = scalar_lea.vmem %s3446_s6, 32  ;;  %p3448_p12 = scmp.lt.s32.totalorder %s3998_s7, %s3446_s6 }
  0x8a   : > { %p3443_p9 = pnand %p3441_p7, %p3948_p0  ;;  %p3449_p3 = scmp.lt.s32.totalorder %s3447_s5, %s3440_s1 }
  0x8c   : > { %p3444_p4 = pneg %p3443_p9  ;;  %p3450_p10 = por %p3449_p3, %p3448_p12 }
  0x8e   : > { %p3451_p11 = pnand %p3450_p10, %p3444_p4 }
  0x90   : > { %3454 = shalt.err (!%p3451_p11)
}
  0x91   : > { %3190 = dma.hbm_to_vmem [thread:$0]  (!%p4568_p5), %s3977_s20, 16, %s3998_s7, %s3942_s16  }
  0x92   : > { %s4569_s17 = sld [smem:[#allocation28_spill]]  ;;  %p4570_p13 = scmp.ne.s32.totalorder %s4560_s25, 0 }
  0x98   : > { %s3455_s27 = scalar_lea.hbm %s4569_s17, 128 }
  0x99   : > { %p3456_p8 = scmp.ne.s32.totalorder %s4569_s17, %s3455_s27  ;;  %p3462_p1 = scmp.lt.u32.totalorder %s3455_s27, %s4569_s17 }
  0x9b   : > { %p3458_p2 = pnand %p3456_p8, %p4570_p13 }
  0x9d   : > { %p3459_p6 = pneg %p3458_p2 }
  0x9f   : > { %p3464_p7 = pnand %p3462_p1, %p3459_p6 }
  0xa1   : > { %3467 = shalt.err (!%p3464_p7)
}
  0xa2   : > { %s3468_s14 = scalar_lea.vmem %s569_s18, 128  ;;  %p3476_p3 = scmp.lt.s32.totalorder %s569_s18, %s569_s18 }
  0xa3   : > { %p3469_p9 = scmp.ne.s32.totalorder %s569_s18, %s3468_s14  ;;  %p3477_p10 = scmp.lt.s32.totalorder %s3468_s14, %s3468_s14 }
  0xa5   : > { %p3471_p4 = pnand %p3469_p9, %p4570_p13  ;;  %p3478_p11 = por %p3477_p10, %p3476_p3 }
  0xa7   : > { %p3472_p12 = pneg %p3471_p4 }
  0xa9   : > { %p3479_p5 = pnand %p3478_p11, %p3472_p12 }
  0xab   : > { %3482 = shalt.err (!%p3479_p5)
}
  0xac   : > { %s4528_s20 = smov 64   ;;  %s4529_s7 = smov 4  }
  0xad   : > { %p4571_p8 = scmp.ne.s32.totalorder %s4557_s26, 0  ;;  %s4572_s10 = sld [smem:[#allocation37_spill]] }
  0xae   : > { %s685_s15 = scalar_lea.vmem [#allocation14], %s3915_s28 }
  0xaf   : > { %3174 = dma.hbm_to_vmem [thread:$0]  (!%p4571_p8), %s4569_s17, 128, %s569_s18, [#allocation7], %s4528_s20, %s4528_s20, %s4529_s7  }
  0xb0   : > { %s692_s29 = sshll.u32 %s685_s15, 4  ;;  %s693_s29 = int_to_ptr.vmem [resolvable:$true] %s692_s29 }
  0xb3   : > { %s4047_s27 = scalar_lea.hbm %s4572_s10, %s3918_s13  ;;  %s3488_s18 = scalar_lea.hbm %s4572_s10, 32 }
  0xb4   : > { %s3483_s22 = scalar_lea.hbm %s4047_s27, 16  ;;  %p3489_p1 = scmp.lt.u32.totalorder %s4047_s27, %s4572_s10 }
  0xb5   : > { %p3484_p5 = scmp.ne.s32.totalorder %s4047_s27, %s3483_s22  ;;  %p3490_p7 = scmp.lt.u32.totalorder %s3488_s18, %s3483_s22 }
  0xb6   : > { %p3492_p4 = scmp.lt.u32.totalorder %s3483_s22, %s4047_s27 }
  0xb7   : > { %p3486_p2 = pnand %p3484_p5, %p3948_p0  ;;  %p3491_p9 = por %p3490_p7, %p3489_p1 }
  0xb9   : > { %p3487_p6 = pneg %p3486_p2  ;;  %p3493_p12 = por %p3492_p4, %p3491_p9 }
  0xbb   : > { %p3494_p3 = pnand %p3493_p12, %p3487_p6 }
  0xbd   : > { %3497 = shalt.err (!%p3494_p3)
}
  0xbe   : > { %s3498_s11 = scalar_lea.vmem %s693_s29, 16  ;;  %s3702_s0 = smov [#allocation14]  }
  0xbf   : > { %p3499_p10 = scmp.ne.s32.totalorder %s693_s29, %s3498_s11  ;;  %s3503_s15 = sshll.u32 %s3702_s0, 4  ;;  %s3504_s15 = int_to_ptr.vmem [resolvable:$false] %s3503_s15 }
  0xc0   : > { %s3505_s1 = scalar_lea.vmem %s3504_s15, 32  ;;  %p3506_p2 = scmp.lt.s32.totalorder %s693_s29, %s3504_s15 }
  0xc1   : > { %p3501_p11 = pnand %p3499_p10, %p3948_p0  ;;  %p3507_p8 = scmp.lt.s32.totalorder %s3505_s1, %s3498_s11 }
  0xc3   : > { %p3502_p5 = pneg %p3501_p11  ;;  %p3508_p13 = por %p3507_p8, %p3506_p2 }
  0xc5   : > { %p3509_p1 = pnand %p3508_p13, %p3502_p5 }
  0xc7   : > { %3512 = shalt.err (!%p3509_p1)
}
  0xc8   : > { %p4573_p7 = scmp.ne.s32.totalorder %s4564_s19, 0  ;;  %s3703_s22 = smov [#allocation8]  }
  0xc9   : > { %s584_s14 = sshll.u32 %s3703_s22, 4  ;;  %s3704_s18 = smov [#allocation9]   ;;  %s585_s14 = int_to_ptr.vmem [resolvable:$true] %s584_s14 }
  0xca   : > { %3193 = dma.hbm_to_vmem [thread:$0]  (!%p4573_p7), %s4047_s27, 16, %s693_s29, %s3942_s16  }
  0xcb   : > { %s598_s6 = sshll.u32 %s3704_s18, 4  ;;  %s4574_s20 = sld [smem:[#allocation30_spill]]  ;;  %s599_s6 = int_to_ptr.vmem [resolvable:$true] %s598_s6 }
  0xcc   : > { %p4576_p8 = scmp.ne.s32.totalorder %s4560_s25, 0 }
  0xd1   : > { %s4575_s7 = smov %s4574_s20  ;;  %s3513_s8 = scalar_lea.hbm %s4574_s20, 256 }
  0xd2   : > { %p3514_p13 = scmp.ne.s32.totalorder %s4575_s7, %s3513_s8  ;;  %p3520_p4 = scmp.lt.u32.totalorder %s3513_s8, %s4575_s7 }
  0xd4   : > { %p3516_p6 = pnand %p3514_p13, %p4576_p8 }
  0xd6   : > { %p3517_p9 = pneg %p3516_p6 }
  0xd8   : > { %p3522_p12 = pnand %p3520_p4, %p3517_p9 }
  0xda   : > { %3525 = shalt.err (!%p3522_p12)
}
  0xdb   : > { %s3526_s27 = scalar_lea.vmem %s585_s14, 256  ;;  %p3534_p5 = scmp.lt.s32.totalorder %s585_s14, %s585_s14 }
  0xdc   : > { %p3527_p3 = scmp.ne.s32.totalorder %s585_s14, %s3526_s27  ;;  %p3535_p2 = scmp.lt.s32.totalorder %s3526_s27, %s3526_s27 }
  0xde   : > { %p3529_p10 = pnand %p3527_p3, %p4576_p8  ;;  %p3536_p1 = por %p3535_p2, %p3534_p5 }
  0xe0   : > { %p3530_p11 = pneg %p3529_p10 }
  0xe2   : > { %p3537_p7 = pnand %p3536_p1, %p3530_p11 }
  0xe4   : > { %3540 = shalt.err (!%p3537_p7)
}
  0xe5   : > { %p4577_p13 = scmp.ne.s32.totalorder %s4557_s26, 0  ;;  %s4578_s20 = smov 4  }
  0xe6   : > { %s4579_s29 = smov 64   ;;  %s4580_s4 = sld [smem:[#allocation31_spill]] }
  0xe7   : > { %3177 = dma.hbm_to_vmem [thread:$0]  (!%p4577_p13), %s4575_s7, 256, %s585_s14, [#allocation7], %s4579_s29, %s4579_s29, %s4578_s20  }
  0xec   : > { %s3541_s5 = scalar_lea.hbm %s4580_s4, 16 }
  0xed   : > { %p3542_p6 = scmp.ne.s32.totalorder %s4580_s4, %s3541_s5  ;;  %p3548_p4 = scmp.lt.u32.totalorder %s3541_s5, %s4580_s4 }
  0xef   : > { %p3544_p7 = pnand %p3542_p6, %p4576_p8 }
  0xf1   : > { %p3545_p9 = pneg %p3544_p7 }
  0xf3   : > { %p3550_p12 = pnand %p3548_p4, %p3545_p9 }
  0xf5   : > { %3553 = shalt.err (!%p3550_p12)
}
  0xf6   : > { %s3554_s27 = scalar_lea.vmem %s599_s6, 16  ;;  %s3561_s14 = scalar_lea.vmem %s599_s6, 32 }
  0xf7   : > { %p3555_p3 = scmp.ne.s32.totalorder %s599_s6, %s3554_s27  ;;  %p3562_p5 = scmp.lt.s32.totalorder %s599_s6, %s599_s6 }
  0xf8   : > { %p3563_p2 = scmp.lt.s32.totalorder %s3561_s14, %s3554_s27 }
  0xf9   : > { %p3557_p10 = pnand %p3555_p3, %p4576_p8 }
  0xfa   : > { %p3564_p1 = por %p3563_p2, %p3562_p5 }
  0xfb   : > { %p3558_p11 = pneg %p3557_p10 }
  0xfd   : > { %p3565_p0 = pnand %p3564_p1, %p3558_p11 }
  0xff   : > { %3568 = shalt.err (!%p3565_p0)
}
 0x100   : > { %3180 = dma.hbm_to_vmem [thread:$0]  (!%p4577_p13), %s4580_s4, 16, %s599_s6, [#allocation10]  }
 0x101   : > { %s4111_s25 = scalar_lea.hbm %s4499_s12, %s3918_s13  ;;  %s710_s22 = scalar_lea.vmem [#allocation15], %s3915_s28 }
 0x102   : > { %s717_s18 = sshll.u32 %s710_s22, 4  ;;  %s3569_s26 = scalar_lea.hbm %s4111_s25, 16  ;;  %s718_s18 = int_to_ptr.vmem [resolvable:$true] %s717_s18 }
 0x103   : > { %p3570_p0 = scmp.ne.s32.totalorder %s4111_s25, %s3569_s26  ;;  %p4581_p8 = scmp.ne.s32.totalorder %s4566_s3, 0 }
 0x104   : > { %s3574_s6 = scalar_lea.hbm %s4499_s12, 32  ;;  %p3575_p13 = scmp.lt.u32.totalorder %s4111_s25, %s4499_s12 }
 0x105   : > { %p3572_p6 = pnand %p3570_p0, %p4581_p8  ;;  %p3576_p9 = scmp.lt.u32.totalorder %s3574_s6, %s3569_s26 }
 0x106   : > { %p3578_p12 = scmp.lt.u32.totalorder %s3569_s26, %s4111_s25 }
 0x107   : > { %p3573_p7 = pneg %p3572_p6  ;;  %p3577_p4 = por %p3576_p9, %p3575_p13 }
 0x109   : > { %p3579_p3 = por %p3578_p12, %p3577_p4 }
 0x10b   : > { %p3580_p10 = pnand %p3579_p3, %p3573_p7 }
 0x10d   : > { %3583 = shalt.err (!%p3580_p10)
}
 0x10e   : > { %s3584_s13 = scalar_lea.vmem %s718_s18, 16  ;;  %s3705_s28 = smov [#allocation15]  }
 0x10f   : > { %p3585_p11 = scmp.ne.s32.totalorder %s718_s18, %s3584_s13  ;;  %s3589_s1 = sshll.u32 %s3705_s28, 4  ;;  %s3590_s1 = int_to_ptr.vmem [resolvable:$false] %s3589_s1 }
 0x110   : > { %s3591_s27 = scalar_lea.vmem %s3590_s1, 32  ;;  %p3592_p1 = scmp.lt.s32.totalorder %s718_s18, %s3590_s1 }
 0x111   : > { %p3587_p5 = pnand %p3585_p11, %p4581_p8  ;;  %p3593_p0 = scmp.lt.s32.totalorder %s3591_s27, %s3584_s13 }
 0x113   : > { %p3588_p2 = pneg %p3587_p5  ;;  %p3594_p6 = por %p3593_p0, %p3592_p1 }
 0x115   : > { %p3595_p9 = pnand %p3594_p6, %p3588_p2 }
 0x117   : > { %3598 = shalt.err (!%p3595_p9)
}
 0x118   : > { %p4582_p13 = scmp.ne.s32.totalorder %s4564_s19, 0  ;;  %p4583_p7 = scmp.ne.s32.totalorder %s4556_s24, 0 }
 0x119   : > { %p4584_p8 = scmp.eq.s32.totalorder (!%p4583_p7), %s3855_s2, 0 }
 0x11a   : > { %3196 = dma.hbm_to_vmem [thread:$0]  (!%p4582_p13), %s4111_s25, 16, %s718_s18, %s3942_s16  }
 0x11b   : > { %752 = sbr.rel (%p4583_p7) target bundleno = 5430 (0x1536), region = 96 }
 0x122   : > { %3650 = dma.done.wait (%p4584_p8), [#allocation4], 256   ;;  %p4585_p4 = pmov %p4584_p8 }
 0x124   : > { %3652 = vsyncadd (%p4585_p4), [#allocation4], 4294967040  ;;  %p4586_p12 = pmov %p4585_p4 }
 0x125   : > { %p4587_p3 = pmov %p4585_p4 }
 0x126   : > { %3654 = dma.done.wait (%p4586_p12), [#allocation7], 384  }
 0x127   : > { %3656 = vsyncadd (%p4587_p3), [#allocation7], 4294966912  ;;  %p4588_p10 = pmov %p4587_p3 }
 0x128   : > { %p4589_p11 = pmov %p4587_p3 }
 0x129   : > { %3658 = dma.done.wait (%p4588_p10), [#allocation10], 16  }
 0x12a   : > { %3660 = vsyncadd (%p4589_p11), [#allocation10], 4294967280  ;;  %s770_s19 = sand.u32 1, %s3855_s2   ;;  %s4148_s24 = sand.u32 1, %s3675_s30  }
 0x12b   : > { %s771_s3 = scalar_lea.sflag [#allocation4], %s770_s19  ;;  %p4590_p5 = scmp.ne.s32.totalorder %s4555_s23, 0 }
 0x12d   : > { %3662 = dma.done.wait (%p4590_p5), %s771_s3, 80  }
 0x12e   : > { %3664 = vsyncadd (%p4590_p5), %s771_s3, 4294967216  ;;  %p900_p2 = scmp.lt.s32.totalorder %s3683_s21, 1  ;;  %s4591_s23 = sld [smem:[#allocation32_spill]] }
 0x12f   : > { %s4592_s26 = sld [smem:[#allocation34_spill]]  ;;  %s4593_s15 = sld [smem:[#allocation38_spill]] }
 0x130   : > { %s4157_s14 = scalar_select %p900_p2, %s3683_s21, 1 }
 0x131   : > { %s4594_s1 = sld [smem:[#allocation39_spill]]  ;;  %s4595_s9 = sld [smem:[#allocation40_spill]] }
 0x132   : > { %s2905_s20 = sshll.u32 %s4157_s14, 4  ;;  %s2908_s29 = sshll.u32 %s4157_s14, 5 }
 0x133   : > { %s4596_s4 = sld [smem:[#allocation41_spill]]  ;;  %s4597_s7 = sld [smem:[#allocation42_spill]] }
 0x134   : > { %s4164_s25 = scalar_lea.vmem %s4591_s23, %s2905_s20  ;;  %s781_s0 = scalar_lea.vmem [#allocation12], %s4148_s24 }
 0x135   : > { %s4169_s5 = scalar_lea.vmem %s4592_s26, %s2905_s20  ;;  %s4174_s11 = scalar_lea.vmem %s4593_s15, %s2905_s20 }
 0x136   : > { %s789_s20 = scalar_lea.vmem [#allocation13], %s4148_s24  ;;  %s797_s6 = scalar_lea.vmem [#allocation14], %s4148_s24 }
 0x137   : > { %s4179_s27 = scalar_lea.vmem %s4594_s1, %s2908_s29  ;;  %s922_s8 = scalar_lea.vmem %s4595_s9, %s4157_s14 }
 0x138   : > { %s805_s15 = scalar_lea.vmem [#allocation15], %s4148_s24  ;;  %p2846_p1 = scmp.ne.s32.totalorder %s3683_s21, 0 }
 0x139   : > { %s925_s22 = scalar_lea.vmem %s4596_s4, %s4157_s14  ;;  %s928_s10 = scalar_lea.vmem %s4597_s7, %s4157_s14  ;;  %v3284_v0 = vld [vmem:[#allocation6] sm:$0xff] (!%p2846_p1)   ;;  %v3706_v1 = vmov (!%p2846_p1), 0.0   ;;  %v935_v2 = vld [vmem:[#allocation3] sm:$0xff] (!%p2846_p1)  ;;  %v936_v3 = vld [vmem:[#allocation3 + $0x8] sm:$0xff] (!%p2846_p1)  ;;  %vm953_vm0 = vcmask (!%p2846_p1), 130048   ;;  %vm3707_vm1 = vmmov (!%p2846_p1), 0  }
 0x13a   : > { %934 = sbr.rel (%p2846_p1) target bundleno = 755 (0x2f3), region = 136  ;;  %2968 = vmatprep.subr.bf16.mxu0 (!%p2846_p1), %v3706_v1  ;;  %2974 = vmatprep.subr.bf16.mxu1 (!%p2846_p1), %v3706_v1  ;;  %v937_v4 = vpack.c.bf16 (!%p2846_p1), %v936_v3, %v935_v2  ;;  %v3285_v5 = vld [vmem:[#allocation8] sm:$0xff] (!%p2846_p1)   ;;  %v3286_v6 = vld [vmem:[#allocation8 + $0x8] sm:$0xff] (!%p2846_p1)   ;;  %s4598_s16 = sld [smem:[#allocation29_spill]] (!%p2846_p1)  ;;  %vm1024_vm2 = vcmask (!%p2846_p1), 261120  }
 0x13b   : > { %2969 = vmatpush3.bf16.msra.mxu0 (!%p2846_p1), %v3284_v0  ;;  %2970 = vmatprep.mubr.msk.bf16.mxu0 (!%p2846_p1), %vm3707_vm1, %v3706_v1  ;;  %v2850_v17 = vld [vmem:[#allocation9] ss:$0 sm:$0xff] (!%p2846_p1) }
 0x13c   : > { %2978 = vmatprep.mubr.msk.bf16.mxu1 (!%p2846_p1), %vm3707_vm1, %v3706_v1  ;;  %2975 = vmatpush3.bf16.msra.mxu1 (!%p2846_p1), %v3285_v5 }
 0x13d   : > { %2976 = vmatprep.subr.bf16.mxu1 (!%p2846_p1), %v3706_v1 }
 0x13e   : > { %2971 = vmatmul.mubr.msk.bf16.vlgmr.msra.gmra.mrb[0].mxu0 (!%p2846_p1), %vm953_vm0, %v937_v4 }
 0x140   : > { %2977 = vmatpush3.bf16.msra.mxu1 (!%p2846_p1), %v3286_v6  ;;  %v2847_v7 = vld [vmem:[%s4598_s16] ss:$0 sm:$0xff] (!%p2846_p1) }
 0x211   : > { %v991_v8 = vpop.f32.mrb[0].mxu0 }
 0x212   : > { %v992_v9 = vadd.f32 %v2847_v7, %v991_v8  ;;  %v2972_v10 = vpop.f32.mrb[1].mxu0 }
 0x213   : > { %v994_v11 = vpop.f32.mrb[2].mxu0 }
 0x214   : > { %v995_v12 = vadd.f32 %v2847_v7, %v994_v11  ;;  %v2973_v13 = vpop.f32.mrb[3].mxu0  ;;  %v998_v14 = vmax.f32 %v992_v9, 0.0 }
 0x216   : > { %v999_v15 = vmax.f32 %v995_v12, 0.0 }
 0x218   : > { %v1000_v16 = vpack.c.bf16 %v999_v15, %v998_v14 }
 0x21a   : > { %2979 = vmatmul.mubr.msk.bf16.vlgmr.msra.gmra.mrb[0].mxu1 %vm1024_vm2, %v1000_v16 }
 0x2ed   : > { %v1062_v18 = vpop.f32.mrb[0].mxu1 }
 0x2ee   : > { %v1063_v19 = vadd.f32 %v2850_v17, %v1062_v18  ;;  %v2980_v20 = vpop.f32.mrb[1].mxu1 }
 0x2ef   : > { %v1065_v21 = vpop.f32.mrb[2].mxu1 }
 0x2f0   : > { %1069 = vst.msk [vmem:[#allocation2] sm:$0xff] %vm1024_vm2, %v1063_v19  ;;  %v1066_v22 = vadd.f32 %v2850_v17, %v1065_v21  ;;  %v2981_v23 = vpop.f32.mrb[3].mxu1 }
 0x2f2   : > { %1070 = vst.msk [vmem:[#allocation2 + $0x8] sm:$0xff] %vm1024_vm2, %v1066_v22 }
 0x2f3 PF: > { %v3287_v24 = vld [vmem:[%s4164_s25] sm:$0xff]   ;;  %v3708_v25 = vmov 0.0   ;;  %v3288_v26 = vld [vmem:[%s4164_s25 + $0x8] sm:$0xff]   ;;  %vm3709_vm3 = vmmov 0   ;;  %vm1097_vm4 = vcmask 261120   ;;  %s4599_s29 = scalar_lea.vmem [#allocation11], %s4148_s24 }
 0x2f4   : > { %2982 = vmatprep.subr.bf16.mxu1 %v3708_v25  ;;  %2996 = vmatprep.subr.bf16.mxu0 %v3708_v25  ;;  %v2854_v30 = vld [vmem:[%s4599_s29] ss:$0 sm:$0xff]  ;;  %s3710_s25 = smov 96   ;;  %vm1147_vm5 = vcmask 64512   ;;  %s3711_s13 = smov 64   ;;  %vm1274_vm6 = vcmask 1043456  }
 0x2f5   : > { %2983 = vmatpush3.bf16.msra.mxu1 %v3287_v24  ;;  %2986 = vmatprep.mubr.msk.bf16.mxu1 %vm3709_vm3, %v3708_v25  ;;  %s3712_s28 = smov 88   ;;  %s3713_s1 = smov 120   ;;  %vm2401_vm7 = vcmask 523264  }
 0x2f6   : > { %2984 = vmatprep.subr.bf16.mxu1 %v3708_v25  ;;  %2998 = vmatprep.mubr.msk.bf16.mxu0 %vm3709_vm3, %v3708_v25  ;;  %s3714_s19 = smov 56   ;;  %s3715_s3 = smov 112  }
 0x2f7   : > { %v4207_v27 = vld [vmem:[#allocation2] sm:$0xff]  ;;  %s3716_s9 = smov 80   ;;  %s3717_s23 = smov 48  }
 0x2f8   : > { %s3718_s18 = smov 72   ;;  %s3719_s26 = smov 104  }
 0x2f9   : > { %v4209_v28 = vld [vmem:[#allocation2 + $0x8] sm:$0xff]  ;;  %2985 = vmatpush3.bf16.msra.mxu1 %v3288_v26  ;;  %s3720_s4 = smov 40   ;;  %p2896_p0 = scmp.ne.s32.totalorder %s3683_s21, 1 }
 0x2fa   : > { %v1073_v29 = vpack.c.bf16 %v4209_v28, %v4207_v27  ;;  %2990 = vmatprep.subr.bf16.mxu1 %v3708_v25  ;;  %s4603_s16 = sld [smem:[#allocation43_spill]] (!%p2896_p0)  ;;  %vm3722_vm8 = vmmov (!%p2896_p0), 0  }
 0x2fc   : > { %2987 = vmatmul.mubr.msk.bf16.vlgmr.msra.gmra.mrb[0].mxu1 %vm1097_vm4, %v1073_v29 }
 0x2fd   : > { %2992 = vmatprep.mubr.msk.bf16.mxu1 %vm3709_vm3, %v3708_v25 }
 0x3cf   : > { %v1135_v31 = vpop.f32.mrb[0].mxu1 }
 0x3d0   : > { %v1136_v32 = vadd.f32 %v2854_v30, %v1135_v31  ;;  %v2988_v33 = vpop.f32.mrb[1].mxu1 }
 0x3d1   : > { %v1138_v34 = vpop.f32.mrb[2].mxu1 }
 0x3d2   : > { %v4222_v35 = vpack.c.bf16 %v1136_v32, %v1136_v32  ;;  %v1139_v36 = vadd.f32 %v2854_v30, %v1138_v34  ;;  %v2989_v37 = vpop.f32.mrb[3].mxu1 }
 0x3d4   : > { %1145 = vrot.lane.b32.xlu0 %v4222_v35, %s3710_s25  ;;  %v4225_v38 = vpack.c.bf16 %v1139_v36, %v1139_v36 }
 0x3d8   : > { %1195 = vrot.lane.b32.xlu0 %v4225_v38, %s3710_s25  ;;  %s4604_s25 = sld [smem:[#allocation44_spill]] (!%p2896_p0) }
 0x446   : > { %v1146_v39 = vpop.permute.xlu0 %1145 }
 0x447   : > { %v1152_v40 = vsel %vm1147_vm5, %v1146_v39, 0 }
 0x448   : > { %2991 = vmatpush3.bf16.xpose.msra.mxu1 %v1152_v40 }
 0x449   : > { %3002 = vmatprep.subr.bf16.mxu1 %v3708_v25 }
 0x44a   : > { %v1196_v41 = vpop.permute.xlu0 %1195 }
 0x44b   : > { %v1201_v42 = vsel %vm1147_vm5, %v1196_v41, 0 }
 0x44c   : > { %2997 = vmatpush3.bf16.xpose.msra.mxu0 %v1201_v42 }
 0x44d   : > { %3008 = vmatprep.subr.bf16.mxu0 %v3708_v25 }
 0x44f   : > { %2993 = vmatmul.mubr.msk.bf16.vlgmr.msra.gmra.mrb[4].mxu1 %vm1147_vm5, %v4222_v35 }
 0x450   : > { %3004 = vmatprep.mubr.msk.bf16.mxu1 %vm3709_vm3, %v3708_v25 }
 0x453   : > { %2999 = vmatmul.mubr.msk.bf16.vlgmr.msra.gmra.mrb[0].mxu0 %vm1147_vm5, %v4225_v38 }
 0x454   : > { %3010 = vmatprep.mubr.msk.bf16.mxu0 %vm3709_vm3, %v3708_v25 }
 0x522   : > { %v1188_v43 = vpop.f32.mrb[4].mxu1 }
 0x523   : > { %v1243_v44 = vmul.f32 0.35355338, %v1188_v43  ;;  %v2994_v45 = vpop.f32.mrb[5].mxu1 }
 0x524   : > { %v1191_v46 = vpop.f32.mrb[6].mxu1 }
 0x525   : > { %v2995_v47 = vpop.f32.mrb[7].mxu1  ;;  %v1245_v48 = vsel %vm1147_vm5, %v1243_v44, -inf }
 0x526   : > { %v1237_v49 = vpop.f32.mrb[0].mxu0  ;;  %1246 = vmax.xlane.f32.xlu1 %v1245_v48 }
 0x527   : > { %v1244_v50 = vmul.f32 0.35355338, %v1237_v49  ;;  %v3000_v51 = vpop.f32.mrb[1].mxu0 }
 0x528   : > { %v1240_v52 = vpop.f32.mrb[2].mxu0 }
 0x529   : > { %v3001_v53 = vpop.f32.mrb[3].mxu0  ;;  %v1248_v54 = vsel %vm1147_vm5, %v1244_v50, -inf }
 0x52a   : > { %1249 = vmax.xlane.f32.xlu1 %v1248_v54 }
 0x53b   : > { %1269 = vrot.lane.b32.xlu1 %v4222_v35, %s3711_s13 }
 0x53f   : > { %1318 = vrot.lane.b32.xlu1 %v4225_v38, %s3711_s13 }
 0x543   : > { %1370 = vrot.lane.b32.xlu1 %v4222_v35, %s3712_s28 }
 0x5b3   : > { %v1247_v55 = vpop.xlane.xlu1 %1246 }
 0x5b4   : > { %v1251_v56 = vsub.f32 %v1243_v44, %v1247_v55 }
 0x5b6   : > { %v1253_v57 = vmul.f32 1.442695, %v1251_v56 }
 0x5b7   : > { %v1250_v58 = vpop.xlane.xlu1 %1249 }
 0x5b8   : > { %3295 = vpow2.f32 %v1253_v57  ;;  %v1252_v59 = vsub.f32 %v1244_v50, %v1250_v58 }
 0x5ba   : > { %v1255_v60 = vmul.f32 1.442695, %v1252_v59 }
 0x5bb   : > { %v1270_v61 = vpop.permute.xlu1 %1269 }
 0x5bc   : > { %3297 = vpow2.f32 %v1255_v60  ;;  %v1276_v62 = vsel %vm1274_vm6, %v1270_v61, 0 }
 0x5bd   : > { %3003 = vmatpush3.bf16.msra.mxu1 %v1276_v62  ;;  %v2866_v62 = vld [vmem:[%s4169_s5 + $0x4] sm:$0xf] }
 0x5be   : > { %3014 = vmatprep.subr.bf16.mxu1 %v3708_v25 }
 0x5bf   : > { %v1319_v63 = vpop.permute.xlu1 %1318 }
 0x5c0   : > { %v1324_v0 = vsel %vm1274_vm6, %v1319_v63, 0 }
 0x5c1   : > { %3009 = vmatpush3.bf16.msra.mxu0 %v1324_v0 }
 0x5c2   : > { %v3296_v1 = vpop.eup %3295  ;;  %3020 = vmatprep.subr.bf16.mxu0 %v3708_v25 }
 0x5c3   : > { %v1257_v2 = vsel %vm1147_vm5, %v3296_v1, 0.0  ;;  %v1371_v5 = vpop.permute.xlu1 %1370 }
 0x5c4   : > { %1258 = vadd.xlane.f32.xlu0 %v1257_v2  ;;  %v1376_v12 = vsel %vm1147_vm5, %v1371_v5, 0 }
 0x5c6   : > { %v3298_v3 = vpop.eup %3297 }
 0x5c7   : > { %v1260_v4 = vsel %vm1147_vm5, %v3298_v3, 0.0 }
 0x5c8   : > { %1261 = vadd.xlane.f32.xlu1 %v1260_v4 }
 0x5d9   : > { %1420 = vrot.lane.b32.xlu1 %v4225_v38, %s3712_s28 }
 0x5da   : > { %1368 = vrot.lane.b32.xlu0 %v4222_v35, %s3713_s1 }
 0x5dd   : > { %1418 = vrot.lane.b32.xlu1 %v4225_v38, %s3713_s1 }
 0x651   : > { %v1259_v6 = vpop.xlane.xlu0 %1258 }
 0x652   : > { %3299 = vrcp.f32 %v1259_v6 }
 0x655   : > { %v1262_v7 = vpop.xlane.xlu1 %1261  ;;  %v1369_v17 = vpop.permute.xlu0 %1368 }
 0x656   : > { %3301 = vrcp.f32 %v1262_v7 }
 0x659   : > { %v1421_v14 = vpop.permute.xlu1 %1420 }
 0x65a   : > { %v1426_v16 = vsel %vm1147_vm5, %v1421_v14, 0 }
 0x65c   : > { %v3300_v8 = vpop.eup %3299 }
 0x65d   : > { %v1265_v9 = vmul.f32 %v3300_v8, %v3296_v1  ;;  %v1419_v18 = vpop.permute.xlu1 %1418  ;;  %v1597_v1 = vsel %vm1274_vm6, %v2866_v62, 0 }
 0x65f   : > { %v1267_v10 = vpack.c.bf16 %v1265_v9, %v1265_v9 }
 0x660   : > { %v3302_v11 = vpop.eup %3301 }
 0x661   : > { %v1266_v13 = vmul.f32 %v3302_v11, %v3298_v3  ;;  %3005 = vmatmul.mubr.msk.bf16.vlgmr.msra.gmra.mrb[8].mxu1 %vm1147_vm5, %v1267_v10  ;;  %v1367_v3 = vld [vmem:[%s4169_s5] sm:$0xf] }
 0x662   : > { %3015 = vmatpush3.bf16.xpose.msra.mxu1 %v1376_v12  ;;  %3016 = vmatprep.mubr.msk.bf16.mxu1 %vm3709_vm3, %v3708_v25  ;;  %v1644_v6 = vsel %vm1274_vm6, %v1367_v3, 0 }
 0x663   : > { %v1268_v15 = vpack.c.bf16 %v1266_v13, %v1266_v13  ;;  %3026 = vmatprep.subr.bf16.mxu1 %v3708_v25 }
 0x665   : > { %3011 = vmatmul.mubr.msk.bf16.vlgmr.msra.gmra.mrb[4].mxu0 %vm1147_vm5, %v1268_v15 }
 0x666   : > { %3021 = vmatpush3.bf16.xpose.msra.mxu0 %v1426_v16  ;;  %3022 = vmatprep.mubr.msk.bf16.mxu0 %vm3709_vm3, %v3708_v25 }
 0x667   : > { %3032 = vmatprep.subr.bf16.mxu0 %v3708_v25 }
 0x669   : > { %3017 = vmatmul.mubr.msk.bf16.vlgmr.msra.gmra.mrb[12].mxu1 %vm1147_vm5, %v1369_v17 }
 0x66a   : > { %3028 = vmatprep.mubr.msk.bf16.mxu1 %vm3709_vm3, %v3708_v25 }
 0x66d   : > { %3023 = vmatmul.mubr.msk.bf16.vlgmr.msra.gmra.mrb[8].mxu0 %vm1147_vm5, %v1419_v18 }
 0x66e   : > { %3034 = vmatprep.mubr.msk.bf16.mxu0 %vm3709_vm3, %v3708_v25 }
 0x734   : > { %v4270_v19 = vpop.f32.mrb[8].mxu1 }
 0x735   : > { %v3006_v20 = vpop.f32.mrb[9].mxu1 }
 0x736   : > { %v1315_v21 = vpop.f32.mrb[10].mxu1 }
 0x737   : > { %v3007_v22 = vpop.f32.mrb[11].mxu1 }
 0x738   : > { %v4272_v23 = vpop.f32.mrb[4].mxu0 }
 0x739   : > { %v1366_v24 = vpack.c.bf16 %v4272_v23, %v4270_v19  ;;  %v3012_v26 = vpop.f32.mrb[5].mxu0 }
 0x73a   : > { %v1363_v29 = vpop.f32.mrb[6].mxu0 }
 0x73b   : > { %v3013_v30 = vpop.f32.mrb[7].mxu0 }
 0x73c   : > { %v1412_v31 = vpop.f32.mrb[12].mxu1 }
 0x73d   : > { %v1468_v32 = vmul.f32 0.35355338, %v1412_v31  ;;  %v3018_v33 = vpop.f32.mrb[13].mxu1 }
 0x73e   : > { %v1415_v34 = vpop.f32.mrb[14].mxu1 }
 0x73f   : > { %v3019_v36 = vpop.f32.mrb[15].mxu1  ;;  %v1470_v37 = vsel %vm1147_vm5, %v1468_v32, -inf }
 0x740   : > { %v1462_v39 = vpop.f32.mrb[8].mxu0  ;;  %1471 = vmax.xlane.f32.xlu1 %v1470_v37 }
 0x741   : > { %v1469_v40 = vmul.f32 0.35355338, %v1462_v39  ;;  %v3024_v41 = vpop.f32.mrb[9].mxu0 }
 0x742   : > { %v1465_v42 = vpop.f32.mrb[10].mxu0 }
 0x743   : > { %v3025_v43 = vpop.f32.mrb[11].mxu0  ;;  %v1473_v44 = vsel %vm1147_vm5, %v1469_v40, -inf }
 0x744   : > { %1474 = vmax.xlane.f32.xlu0 %v1473_v44 }
 0x75a   : > { %1542 = vrot.lane.b32.xlu0 %v4225_v38, %s3714_s19 }
 0x75e   : > { %1687 = vrot.lane.b32.xlu0 %v4222_v35, %s3715_s3 }
 0x7cd   : > { %v1472_v45 = vpop.xlane.xlu1 %1471 }
 0x7ce   : > { %v1476_v46 = vsub.f32 %v1468_v32, %v1472_v45 }
 0x7d0   : > { %v1478_v47 = vmul.f32 1.442695, %v1476_v46 }
 0x7d1   : > { %v1475_v48 = vpop.xlane.xlu0 %1474 }
 0x7d2   : > { %3303 = vpow2.f32 %v1478_v47  ;;  %v1477_v49 = vsub.f32 %v1469_v40, %v1475_v48 }
 0x7d4   : > { %v1480_v50 = vmul.f32 1.442695, %v1477_v49 }
 0x7d5   : > { %v1543_v51 = vpop.permute.xlu0 %1542 }
 0x7d6   : > { %3305 = vpow2.f32 %v1480_v50  ;;  %v1548_v52 = vsel %vm1274_vm6, %v1543_v51, 0 }
 0x7d7   : > { %3033 = vmatpush3.bf16.msra.mxu0 %v1548_v52 }
 0x7d8   : > { %3044 = vmatprep.subr.bf16.mxu0 %v3708_v25 }
 0x7d9   : > { %v1688_v23 = vpop.permute.xlu0 %1687 }
 0x7dc   : > { %v3304_v53 = vpop.eup %3303 }
 0x7dd   : > { %v1482_v54 = vsel %vm1147_vm5, %v3304_v53, 0.0 }
 0x7de   : > { %1483 = vadd.xlane.f32.xlu1 %v1482_v54 }
 0x7e0   : > { %v3306_v55 = vpop.eup %3305 }
 0x7e1   : > { %v1485_v56 = vsel %vm1147_vm5, %v3306_v55, 0.0 }
 0x7e2   : > { %1486 = vadd.xlane.f32.xlu1 %v1485_v56 }
 0x7f3   : > { %1494 = vrot.lane.b32.xlu1 %v4222_v35, %s3714_s19 }
 0x7f7   : > { %1689 = vrot.lane.b32.xlu1 %v4222_v35, %s3716_s9 }
 0x7fb   : > { %1739 = vrot.lane.b32.xlu1 %v4225_v38, %s3716_s9 }
 0x7ff   : > { %1737 = vrot.lane.b32.xlu1 %v4225_v38, %s3715_s3 }
 0x86b   : > { %v1484_v57 = vpop.xlane.xlu1 %1483 }
 0x86c   : > { %3307 = vrcp.f32 %v1484_v57 }
 0x86f   : > { %v1487_v58 = vpop.xlane.xlu1 %1486 }
 0x870   : > { %3309 = vrcp.f32 %v1487_v58 }
 0x873   : > { %v1495_v59 = vpop.permute.xlu1 %1494 }
 0x874   : > { %v1500_v60 = vsel %vm1274_vm6, %v1495_v59, 0 }
 0x875   : > { %3027 = vmatpush3.bf16.msra.mxu1 %v1500_v60 }
 0x876   : > { %v3308_v61 = vpop.eup %3307  ;;  %3038 = vmatprep.subr.bf16.mxu1 %v3708_v25 }
 0x877   : > { %v1490_v63 = vmul.f32 %v3308_v61, %v3304_v53  ;;  %v1690_v7 = vpop.permute.xlu1 %1689 }
 0x878   : > { %v1695_v19 = vsel %vm1147_vm5, %v1690_v7, 0 }
 0x879   : > { %v1492_v0 = vpack.c.bf16 %v1490_v63, %v1490_v63 }
 0x87a   : > { %v3310_v2 = vpop.eup %3309 }
 0x87b   : > { %v1491_v4 = vmul.f32 %v3310_v2, %v3306_v55  ;;  %3029 = vmatmul.mubr.msk.bf16.vlgmr.msra.gmra.mrb[16].mxu1 %vm1147_vm5, %v1492_v0  ;;  %v1740_v8 = vpop.permute.xlu1 %1739 }
 0x87c   : > { %3039 = vmatpush3.bf16.msra.mxu1 %v1597_v1  ;;  %3040 = vmatprep.mubr.msk.bf16.mxu1 %vm3709_vm3, %v3708_v25  ;;  %v1745_v9 = vsel %vm1147_vm5, %v1740_v8, 0 }
 0x87d   : > { %v1493_v5 = vpack.c.bf16 %v1491_v4, %v1491_v4  ;;  %3050 = vmatprep.subr.bf16.mxu1 %v3708_v25 }
 0x87f   : > { %3035 = vmatmul.mubr.msk.bf16.vlgmr.msra.gmra.mrb[12].mxu0 %vm1147_vm5, %v1493_v5  ;;  %v1738_v10 = vpop.permute.xlu1 %1737 }
 0x880   : > { %3045 = vmatpush3.bf16.msra.mxu0 %v1644_v6  ;;  %3046 = vmatprep.mubr.msk.bf16.mxu0 %vm3709_vm3, %v3708_v25 }
 0x881   : > { %3056 = vmatprep.subr.bf16.mxu0 %v3708_v25 }
 0x887   : > { %3047 = vmatmul.mubr.msk.bf16.vlgmr.msra.gmra.mrb[16].mxu0 %vm1147_vm5, %v1366_v24 }
 0x888   : > { %3058 = vmatprep.mubr.msk.bf16.mxu0 %vm3709_vm3, %v3708_v25 }
 0x889   : > { %3057 = vmatpush3.bf16.xpose.msra.mxu0 %v1745_v9 }
 0x88a   : > { %3068 = vmatprep.subr.bf16.mxu0 %v3708_v25 }
 0x890   : > { %3059 = vmatmul.mubr.msk.bf16.vlgmr.msra.gmra.mrb[20].mxu0 %vm1147_vm5, %v1738_v10  ;;  %v2873_v10 = vld [vmem:[%s4169_s5 + $0x8] sm:$0xf] }
 0x891   : > { %3070 = vmatprep.mubr.msk.bf16.mxu0 %vm3709_vm3, %v3708_v25 }
 0x94e   : > { %v1536_v11 = vpop.f32.mrb[16].mxu1 }
 0x94f   : > { %v3030_v12 = vpop.f32.mrb[17].mxu1 }
 0x950   : > { %v1539_v13 = vpop.f32.mrb[18].mxu1 }
 0x951   : > { %v3031_v14 = vpop.f32.mrb[19].mxu1 }
 0x952   : > { %v1584_v15 = vpop.f32.mrb[12].mxu0 }
 0x953   : > { %v1590_v16 = vpack.c.bf16 %v1584_v15, %v1536_v11  ;;  %v3036_v17 = vpop.f32.mrb[13].mxu0  ;;  %v1916_v11 = vsel %vm1274_vm6, %v2873_v10, 0 }
 0x954   : > { %v1587_v18 = vpop.f32.mrb[14].mxu0 }
 0x955   : > { %v3037_v20 = vpop.f32.mrb[15].mxu0  ;;  %3041 = vmatmul.mubr.msk.bf16.vlgmr.msra.gmra.mrb[20].mxu1 %vm1147_vm5, %v1590_v16 }
 0x956   : > { %3051 = vmatpush3.bf16.xpose.msra.mxu1 %v1695_v19  ;;  %3052 = vmatprep.mubr.msk.bf16.mxu1 %vm3709_vm3, %v3708_v25 }
 0x957   : > { %3062 = vmatprep.subr.bf16.mxu1 %v3708_v25 }
 0x95a   : > { %v1680_v21 = vpop.f32.mrb[16].mxu0 }
 0x95b   : > { %v3048_v22 = vpop.f32.mrb[17].mxu0 }
 0x95c   : > { %v1683_v24 = vpop.f32.mrb[18].mxu0 }
 0x95d   : > { %v3049_v26 = vpop.f32.mrb[19].mxu0  ;;  %3053 = vmatmul.mubr.msk.bf16.vlgmr.msra.gmra.mrb[24].mxu1 %vm1147_vm5, %v1688_v23 }
 0x95e   : > { %3064 = vmatprep.mubr.msk.bf16.mxu1 %vm3709_vm3, %v3708_v25 }
 0x963   : > { %v1781_v29 = vpop.f32.mrb[20].mxu0 }
 0x964   : > { %v1788_v30 = vmul.f32 0.35355338, %v1781_v29  ;;  %v3060_v31 = vpop.f32.mrb[21].mxu0 }
 0x965   : > { %v1784_v32 = vpop.f32.mrb[22].mxu0 }
 0x966   : > { %v3061_v33 = vpop.f32.mrb[23].mxu0  ;;  %v1792_v34 = vsel %vm1147_vm5, %v1788_v30, -inf }
 0x967   : > { %1793 = vmax.xlane.f32.xlu1 %v1792_v34 }
 0x978   : > { %1813 = vrot.lane.b32.xlu1 %v4222_v35, %s3717_s23 }
 0x97c   : > { %1963 = vrot.lane.b32.xlu1 %v4222_v35, %s3718_s18 }
 0x980   : > { %2013 = vrot.lane.b32.xlu1 %v4225_v38, %s3718_s18 }
 0x984   : > { %2011 = vrot.lane.b32.xlu1 %v4225_v38, %s3719_s26 }
 0x9f4   : > { %v1794_v36 = vpop.xlane.xlu1 %1793 }
 0x9f5   : > { %v1796_v40 = vsub.f32 %v1788_v30, %v1794_v36 }
 0x9f7   : > { %v1799_v41 = vmul.f32 1.442695, %v1796_v40 }
 0x9f8   : > { %v1814_v37 = vpop.permute.xlu1 %1813 }
 0x9f9   : > { %v1819_v39 = vsel %vm1274_vm6, %v1814_v37, 0  ;;  %3311 = vpow2.f32 %v1799_v41 }
 0x9fa   : > { %3063 = vmatpush3.bf16.msra.mxu1 %v1819_v39 }
 0x9fb   : > { %3074 = vmatprep.subr.bf16.mxu1 %v3708_v25 }
 0x9fc   : > { %v1964_v5 = vpop.permute.xlu1 %1963 }
 0x9fd   : > { %v1969_v7 = vsel %vm1147_vm5, %v1964_v5, 0 }
 0xa00   : > { %v2014_v16 = vpop.permute.xlu1 %2013 }
 0xa03   : > { %v3312_v54 = vpop.eup %3311 }
 0xa04   : > { %v1804_v55 = vsel %vm1147_vm5, %v3312_v54, 0.0  ;;  %v2012_v32 = vpop.permute.xlu1 %2011 }
 0xa28   : > { %v1633_v42 = vpop.f32.mrb[20].mxu1 }
 0xa29   : > { %v4330_v43 = vadd.f32 %v1680_v21, %v1633_v42  ;;  %v3042_v44 = vpop.f32.mrb[21].mxu1  ;;  %v2019_v21 = vsel %vm1147_vm5, %v2014_v16, 0 }
 0xa2a   : > { %v1636_v45 = vpop.f32.mrb[22].mxu1 }
 0xa2b   : > { %v4332_v46 = vadd.f32 %v1683_v24, %v1636_v45  ;;  %v3043_v47 = vpop.f32.mrb[23].mxu1 }
 0xa30   : > { %v1731_v48 = vpop.f32.mrb[24].mxu1 }
 0xa31   : > { %v1787_v49 = vmul.f32 0.35355338, %v1731_v48  ;;  %v3054_v50 = vpop.f32.mrb[25].mxu1 }
 0xa32   : > { %v1734_v51 = vpop.f32.mrb[26].mxu1 }
 0xa33   : > { %v3055_v52 = vpop.f32.mrb[27].mxu1  ;;  %v1789_v53 = vsel %vm1147_vm5, %v1787_v49, -inf }
 0xa34   : > { %1790 = vmax.xlane.f32.xlu0 %v1789_v53 }
 0xa38   : > { %1805 = vadd.xlane.f32.xlu0 %v1804_v55 }
 0xac1   : > { %v1791_v56 = vpop.xlane.xlu0 %1790 }
 0xac2   : > { %v1795_v57 = vsub.f32 %v1787_v49, %v1791_v56 }
 0xac4   : > { %v1797_v58 = vmul.f32 1.442695, %v1795_v57 }
 0xac5   : > { %v1806_v61 = vpop.xlane.xlu0 %1805 }
 0xac6   : > { %3313 = vpow2.f32 %v1797_v58 }
 0xac7   : > { %3315 = vrcp.f32 %v1806_v61 }
 0xad0   : > { %v3314_v59 = vpop.eup %3313 }
 0xad1   : > { %v1801_v60 = vsel %vm1147_vm5, %v3314_v59, 0.0  ;;  %v3316_v62 = vpop.eup %3315 }
 0xad2   : > { %1802 = vadd.xlane.f32.xlu0 %v1801_v60  ;;  %v1810_v0 = vmul.f32 %v3316_v62, %v3312_v54  ;;  %v2879_v62 = vld [vmem:[%s4169_s5 + $0xc] sm:$0xf] }
 0xad4   : > { %v1812_v3 = vpack.c.bf16 %v1810_v0, %v1810_v0 }
 0xae8   : > { %1861 = vrot.lane.b32.xlu0 %v4225_v38, %s3717_s23 }
 0xaec   : > { %1961 = vrot.lane.b32.xlu0 %v4222_v35, %s3719_s26 }
 0xb5f   : > { %v1803_v63 = vpop.xlane.xlu0 %1802 }
 0xb60   : > { %3317 = vrcp.f32 %v1803_v63  ;;  %v2190_v63 = vsel %vm1274_vm6, %v2879_v62, 0  ;;  %v2884_v62 = vld [vmem:[%s805_s15] ss:$0 sm:$0xff] }
 0xb63   : > { %v1862_v1 = vpop.permute.xlu0 %1861 }
 0xb64   : > { %v1867_v2 = vsel %vm1274_vm6, %v1862_v1, 0 }
 0xb65   : > { %3069 = vmatpush3.bf16.msra.mxu0 %v1867_v2 }
 0xb66   : > { %3080 = vmatprep.subr.bf16.mxu0 %v3708_v25 }
 0xb67   : > { %v1962_v9 = vpop.permute.xlu0 %1961 }
 0xb68   : > { %3071 = vmatmul.mubr.msk.bf16.vlgmr.msra.gmra.mrb[24].mxu0 %vm1147_vm5, %v1812_v3 }
 0xb69   : > { %3082 = vmatprep.mubr.msk.bf16.mxu0 %vm3709_vm3, %v3708_v25 }
 0xb6a   : > { %v3318_v4 = vpop.eup %3317 }
 0xb6b   : > { %v1809_v6 = vmul.f32 %v3318_v4, %v3314_v59 }
 0xb6d   : > { %v1811_v8 = vpack.c.bf16 %v1809_v6, %v1809_v6 }
 0xb6e   : > { %3081 = vmatpush3.bf16.xpose.msra.mxu0 %v1969_v7 }
 0xb6f   : > { %3065 = vmatmul.mubr.msk.bf16.vlgmr.msra.gmra.mrb[28].mxu1 %vm1147_vm5, %v1811_v8  ;;  %3092 = vmatprep.subr.bf16.mxu0 %v3708_v25 }
 0xb70   : > { %3076 = vmatprep.mubr.msk.bf16.mxu1 %vm3709_vm3, %v3708_v25  ;;  %3075 = vmatpush3.bf16.msra.mxu1 %v1916_v11 }
 0xb71   : > { %3086 = vmatprep.subr.bf16.mxu1 %v3708_v25 }
 0xb75   : > { %3083 = vmatmul.mubr.msk.bf16.vlgmr.msra.gmra.mrb[28].mxu0 %vm1147_vm5, %v1962_v9 }
 0xb76   : > { %3094 = vmatprep.mubr.msk.bf16.mxu0 %vm3709_vm3, %v3708_v25 }
 0xc3b   : > { %v1903_v12 = vpop.f32.mrb[24].mxu0 }
 0xc3c   : > { %v3072_v13 = vpop.f32.mrb[25].mxu0 }
 0xc3d   : > { %v1906_v14 = vpop.f32.mrb[26].mxu0 }
 0xc3e   : > { %v3073_v15 = vpop.f32.mrb[27].mxu0 }
 0xc3f   : > { %v2881_v15 = vld [vmem:[%s781_s0] ss:$0 sm:$0xff] }
 0xc42   : > { %v1855_v17 = vpop.f32.mrb[28].mxu1 }
 0xc43   : > { %v1909_v18 = vpack.c.bf16 %v1903_v12, %v1855_v17  ;;  %v3066_v19 = vpop.f32.mrb[29].mxu1 }
 0xc44   : > { %v1858_v20 = vpop.f32.mrb[30].mxu1 }
 0xc45   : > { %v3067_v22 = vpop.f32.mrb[31].mxu1  ;;  %3077 = vmatmul.mubr.msk.bf16.vlgmr.msra.gmra.mrb[32].mxu1 %vm1147_vm5, %v1909_v18 }
 0xc46   : > { %3087 = vmatpush3.bf16.xpose.msra.mxu1 %v2019_v21  ;;  %3088 = vmatprep.mubr.msk.bf16.mxu1 %vm3709_vm3, %v3708_v25 }
 0xc47   : > { %3098 = vmatprep.subr.bf16.mxu1 %v3708_v25 }
 0xc48   : > { %v2005_v23 = vpop.f32.mrb[28].mxu0 }
 0xc49   : > { %v2061_v24 = vmul.f32 0.35355338, %v2005_v23  ;;  %v3084_v26 = vpop.f32.mrb[29].mxu0 }
 0xc4a   : > { %v2008_v29 = vpop.f32.mrb[30].mxu0 }
 0xc4b   : > { %v3085_v30 = vpop.f32.mrb[31].mxu0  ;;  %v2063_v31 = vsel %vm1147_vm5, %v2061_v24, -inf }
 0xc4c   : > { %2064 = vmax.xlane.f32.xlu0 %v2063_v31 }
 0xc4d   : > { %3089 = vmatmul.mubr.msk.bf16.vlgmr.msra.gmra.mrb[36].mxu1 %vm1147_vm5, %v2012_v32 }
 0xc4e   : > { %3100 = vmatprep.mubr.msk.bf16.mxu1 %vm3709_vm3, %v3708_v25 }
 0xcd9   : > { %v2065_v33 = vpop.xlane.xlu0 %2064 }
 0xcda   : > { %v2069_v34 = vsub.f32 %v2061_v24, %v2065_v33 }
 0xcdc   : > { %v2071_v36 = vmul.f32 1.442695, %v2069_v34 }
 0xcde   : > { %3319 = vpow2.f32 %v2071_v36 }
 0xce8   : > { %v3320_v37 = vpop.eup %3319 }
 0xce9   : > { %v2075_v39 = vsel %vm1147_vm5, %v3320_v37, 0.0 }
 0xcea   : > { %2076 = vadd.xlane.f32.xlu0 %v2075_v39 }
 0xd18   : > { %v1952_v40 = vpop.f32.mrb[32].mxu1 }
 0xd19   : > { %v1959_v41 = vadd.f32 %v1952_v40, %v4330_v43  ;;  %v3078_v42 = vpop.f32.mrb[33].mxu1  ;;  %v3289_v40 = vld [vmem:[%s4174_s11] sm:$0xff]  }
 0xd1a   : > { %v1955_v44 = vpop.f32.mrb[34].mxu1  ;;  %v3291_v42 = vld [vmem:[%s4179_s27] sm:$0xff]  }
 0xd1b   : > { %v1960_v45 = vadd.f32 %v1955_v44, %v4332_v46  ;;  %v3079_v47 = vpop.f32.mrb[35].mxu1  ;;  %v3292_v44 = vld [vmem:[%s4179_s27 + $0x8] sm:$0xff]  }
 0xd20   : > { %v2055_v48 = vpop.f32.mrb[36].mxu1 }
 0xd21   : > { %v2062_v49 = vmul.f32 0.35355338, %v2055_v48  ;;  %v3090_v50 = vpop.f32.mrb[37].mxu1 }
 0xd22   : > { %v2058_v51 = vpop.f32.mrb[38].mxu1 }
 0xd23   : > { %v3091_v52 = vpop.f32.mrb[39].mxu1  ;;  %v2066_v53 = vsel %vm1147_vm5, %v2062_v49, -inf }
 0xd24   : > { %2067 = vmax.xlane.f32.xlu1 %v2066_v53  ;;  %v2882_v53 = vld [vmem:[%s789_s20] ss:$0 sm:$0xff] }
 0xd35   : > { %2087 = vrot.lane.b32.xlu1 %v4222_v35, %s3720_s4 }
 0xd77   : > { %v2077_v54 = vpop.xlane.xlu0 %2076 }
 0xd78   : > { %3321 = vrcp.f32 %v2077_v54 }
 0xd82   : > { %v3322_v55 = vpop.eup %3321 }
 0xd83   : > { %v2083_v57 = vmul.f32 %v3322_v55, %v3320_v37 }
 0xd85   : > { %v2085_v60 = vpack.c.bf16 %v2083_v57, %v2083_v57  ;;  %v2883_v57 = vld [vmem:[%s797_s6] ss:$0 sm:$0xff] }
 0xdb1   : > { %v2068_v43 = vpop.xlane.xlu1 %2067 }
 0xdb2   : > { %v2070_v56 = vsub.f32 %v2062_v49, %v2068_v43 }
 0xdb4   : > { %v2073_v46 = vmul.f32 1.442695, %v2070_v56 }
 0xdb5   : > { %v2088_v58 = vpop.permute.xlu1 %2087 }
 0xdb6   : > { %3323 = vpow2.f32 %v2073_v46  ;;  %v2093_v59 = vsel %vm1274_vm6, %v2088_v58, 0 }
 0xdb7   : > { %3093 = vmatpush3.bf16.msra.mxu0 %v2093_v59 }
 0xdb8   : > { %3104 = vmatprep.subr.bf16.mxu0 %v3708_v25 }
 0xdba   : > { %3095 = vmatmul.mubr.msk.bf16.vlgmr.msra.gmra.mrb[32].mxu0 %vm1147_vm5, %v2085_v60 }
 0xdbb   : > { %3106 = vmatprep.mubr.msk.bf16.mxu0 %vm3709_vm3, %v3708_v25  ;;  %3105 = vmatpush3.bf16.msra.mxu0 %v2190_v63 }
 0xdbc   : > { %3118 = vmatprep.subr.bf16.mxu0 %v3708_v25 }
 0xdc0   : > { %v3324_v35 = vpop.eup %3323 }
 0xdc1   : > { %v2078_v61 = vsel %vm1147_vm5, %v3324_v35, 0.0 }
 0xdc2   : > { %2079 = vadd.xlane.f32.xlu0 %v2078_v61  ;;  %v3294_v61 = vld [vmem:[%s4179_s27 + $0x18] sm:$0xff]  }
 0xdd8   : > { %2135 = vrot.lane.b32.xlu0 %v4225_v38, %s3720_s4 }
 0xe4f   : > { %v2080_v0 = vpop.xlane.xlu0 %2079 }
 0xe50   : > { %3325 = vrcp.f32 %v2080_v0 }
 0xe53   : > { %v2136_v1 = vpop.permute.xlu0 %2135 }
 0xe54   : > { %v2141_v2 = vsel %vm1274_vm6, %v2136_v1, 0 }
 0xe55   : > { %3099 = vmatpush3.bf16.msra.mxu1 %v2141_v2 }
 0xe56   : > { %3110 = vmatprep.subr.bf16.mxu1 %v3708_v25 }
 0xe5a   : > { %v3326_v3 = vpop.eup %3325 }
 0xe5b   : > { %v2084_v4 = vmul.f32 %v3326_v3, %v3324_v35  ;;  %v3293_v35 = vld [vmem:[%s4179_s27 + $0x10] sm:$0xff]  }
 0xe5d   : > { %v2086_v5 = vpack.c.bf16 %v2084_v4, %v2084_v4 }
 0xe5f   : > { %3101 = vmatmul.mubr.msk.bf16.vlgmr.msra.gmra.mrb[40].mxu1 %vm1147_vm5, %v2086_v5 }
 0xe60   : > { %3114 = vmatprep.mubr.msk.bf16.mxu1 %vm3709_vm3, %v3708_v25  ;;  %3111 = vmatpush3.bf16.msra.mxu1 %v3289_v40  ;;  %v2895_v40 = vld [vmem:[%s928_s10] ss:$0 sm:$0xff] }
 0xe61   : > { %3112 = vmatprep.subr.bf16.mxu1 %v3708_v25 }
 0xe8d   : > { %v2129_v38 = vpop.f32.mrb[32].mxu0 }
 0xe8e   : > { %v3096_v6 = vpop.f32.mrb[33].mxu0 }
 0xe8f   : > { %v2132_v7 = vpop.f32.mrb[34].mxu0 }
 0xe90   : > { %v3097_v8 = vpop.f32.mrb[35].mxu0 }
 0xf32   : > { %v2177_v9 = vpop.f32.mrb[40].mxu1 }
 0xf33   : > { %v2183_v10 = vpack.c.bf16 %v2177_v9, %v2129_v38  ;;  %v3102_v11 = vpop.f32.mrb[41].mxu1 }
 0xf34   : > { %v2180_v12 = vpop.f32.mrb[42].mxu1 }
 0xf35   : > { %v3103_v13 = vpop.f32.mrb[43].mxu1  ;;  %3107 = vmatmul.mubr.msk.bf16.vlgmr.msra.gmra.mrb[36].mxu0 %vm1147_vm5, %v2183_v10 }
 0xf36   : > { %3126 = vmatprep.mubr.msk.bf16.mxu0 %vm3709_vm3, %v3708_v25  ;;  %3119 = vmatpush3.bf16.msra.mxu0 %v3291_v42 }
 0xf37   : > { %3120 = vmatprep.subr.bf16.mxu0 %v3708_v25 }
 0xf3a   : > { %3121 = vmatpush3.bf16.msra.mxu0 %v3292_v44 }
 0xf3b   : > { %3122 = vmatprep.subr.bf16.mxu0 %v3708_v25 }
 0xf3e   : > { %3123 = vmatpush3.bf16.msra.mxu0 %v3293_v35 }
 0xf3f   : > { %3124 = vmatprep.subr.bf16.mxu0 %v3708_v25  ;;  %v2888_v25 = vld [vmem:[%s922_s8] ss:$0 sm:$0xff] }
 0xf42   : > { %3125 = vmatpush3.bf16.msra.mxu0 %v3294_v61 }
0x1008   : > { %v2226_v14 = vpop.f32.mrb[36].mxu0 }
0x1009   : > { %v2233_v16 = vadd.f32 %v2226_v14, %v1959_v41  ;;  %v3108_v17 = vpop.f32.mrb[37].mxu0  ;;  %v3290_v41 = vld [vmem:[%s4174_s11 + $0x8] sm:$0xff]  }
0x100a   : > { %v2229_v18 = vpop.f32.mrb[38].mxu0  ;;  %3113 = vmatpush3.bf16.msra.mxu1 %v3290_v41 }
0x100b   : > { %v2242_v19 = vadd.f32 %v2881_v15, %v2233_v16  ;;  %v2234_v20 = vadd.f32 %v2229_v18, %v1960_v45  ;;  %v3109_v21 = vpop.f32.mrb[39].mxu0 }
0x100d   : > { %v2243_v22 = vadd.f32 %v2881_v15, %v2234_v20  ;;  %v2244_v23 = vadd.f32 %v2242_v19, %v4207_v27 }
0x100f   : > { %v2248_v24 = vsel %vm1097_vm4, %v2244_v23, 0.0  ;;  %v2245_v26 = vadd.f32 %v2243_v22, %v4209_v28 }
0x1010   : > { %2249 = vadd.xlane.f32.xlu1 %v2248_v24 }
0x1011   : > { %v2251_v29 = vsel %vm1097_vm4, %v2245_v26, 0.0 }
0x1012   : > { %2252 = vadd.xlane.f32.xlu0 %v2251_v29 }
0x109d   : > { %v2250_v30 = vpop.xlane.xlu1 %2249 }
0x109e   : > { %v2255_v31 = vmul.f32 0.03125, %v2250_v30 }
0x109f   : > { %v2253_v32 = vpop.xlane.xlu0 %2252 }
0x10a0   : > { %v2257_v33 = vsub.f32 %v2244_v23, %v2255_v31  ;;  %v2256_v34 = vmul.f32 0.03125, %v2253_v32 }
0x10a2   : > { %v2258_v36 = vsub.f32 %v2245_v26, %v2256_v34  ;;  %v2259_v37 = vmul.f32 %v2257_v33, %v2257_v33 }
0x10a4   : > { %v2261_v27 = vsel %vm1097_vm4, %v2259_v37, 0.0  ;;  %v2260_v39 = vmul.f32 %v2258_v36, %v2258_v36 }
0x10a5   : > { %2262 = vadd.xlane.f32.xlu1 %v2261_v27  ;;  %v2894_v27 = vld [vmem:[%s925_s22] ss:$0 sm:$0xff] }
0x10a6   : > { %v2264_v28 = vsel %vm1097_vm4, %v2260_v39, 0.0 }
0x10a7   : > { %2265 = vadd.xlane.f32.xlu0 %v2264_v28 }
0x1132   : > { %v2263_v45 = vpop.xlane.xlu1 %2262 }
0x1133   : > { %v2267_v47 = vmul.f32 0.03125, %v2263_v45 }
0x1134   : > { %v2266_v48 = vpop.xlane.xlu0 %2265 }
0x1135   : > { %v2269_v49 = vadd.f32 1e-05, %v2267_v47  ;;  %v2268_v50 = vmul.f32 0.03125, %v2266_v48  ;;  %v3335_v48 = vld [vmem:[%s4603_s16] sm:$0xff] (!%p2896_p0)  }
0x1137   : > { %3327 = vrsqrt.f32 %v2269_v49  ;;  %v2270_v51 = vadd.f32 1e-05, %v2268_v50  ;;  %v3721_v49 = vmov (!%p2896_p0), 0.0   ;;  %v3336_v50 = vld [vmem:[%s4603_s16 + $0x8] sm:$0xff] (!%p2896_p0)  }
0x1138   : > { %3130 = vmatprep.subr.bf16.mxu0 (!%p2896_p0), %v3721_v49 }
0x1139   : > { %3329 = vrsqrt.f32 %v2270_v51 }
0x1141   : > { %v3328_v52 = vpop.eup %3327 }
0x1142   : > { %v2273_v54 = vmul.f32 %v3328_v52, %v2257_v33  ;;  %v2897_v52 = vld [vmem:[%s4604_s25] ss:$0 sm:$0xff] (!%p2896_p0) }
0x1143   : > { %v3330_v55 = vpop.eup %3329 }
0x1144   : > { %v2281_v43 = vmul.f32 %v2882_v53, %v2273_v54  ;;  %v2274_v56 = vmul.f32 %v3330_v55, %v2258_v36 }
0x1146   : > { %v2282_v46 = vmul.f32 %v2882_v53, %v2274_v56  ;;  %v2289_v58 = vadd.f32 %v2883_v57, %v2281_v43 }
0x1148   : > { %v2290_v59 = vadd.f32 %v2883_v57, %v2282_v46 }
0x114a   : > { %v2291_v60 = vpack.c.bf16 %v2290_v59, %v2289_v58 }
0x114c   : > { %3115 = vmatmul.mubr.msk.bf16.vlgmr.msra.gmra.mrb[44].mxu1 %vm1097_vm4, %v2291_v60 }
0x121f   : > { %v2352_v63 = vpop.f32.mrb[44].mxu1 }
0x1220   : > { %v2353_v0 = vadd.f32 %v2884_v62, %v2352_v63  ;;  %v3116_v1 = vpop.f32.mrb[45].mxu1 }
0x1221   : > { %v2355_v2 = vpop.f32.mrb[46].mxu1 }
0x1222   : > { %v2356_v3 = vadd.f32 %v2884_v62, %v2355_v2  ;;  %v3117_v4 = vpop.f32.mrb[47].mxu1  ;;  %v2359_v5 = vmax.f32 %v2353_v0, 0.0 }
0x1224   : > { %v2360_v38 = vmax.f32 %v2356_v3, 0.0 }
0x1226   : > { %v2361_v6 = vpack.c.bf16 %v2360_v38, %v2359_v5 }
0x1228   : > { %3127 = vmatmul.mubr.msk.bf16.vlgmr.msra.gmra.mrb[40].mxu0 %vm2401_vm7, %v2361_v6 }
0x1229   : > { %3131 = vmatpush3.bf16.msra.mxu0 (!%p2896_p0), %v3335_v48  ;;  %3134 = vmatprep.mubr.msk.bf16.mxu0 (!%p2896_p0), %vm3722_vm8, %v3721_v49 }
0x122a   : > { %3132 = vmatprep.subr.bf16.mxu0 (!%p2896_p0), %v3721_v49 }
0x122d   : > { %3133 = vmatpush3.bf16.msra.mxu0 (!%p2896_p0), %v3336_v50 }
0x12fb   : > { %v2439_v7 = vpop.f32.mrb[40].mxu0 }
0x12fc   : > { %v2440_v8 = vadd.f32 %v2888_v25, %v2439_v7  ;;  %v3128_v9 = vpop.f32.mrb[41].mxu0 }
0x12fd   : > { %v2442_v10 = vpop.f32.mrb[42].mxu0 }
0x12fe   : > { %v2443_v11 = vadd.f32 %v2888_v25, %v2442_v10  ;;  %v3129_v12 = vpop.f32.mrb[43].mxu0  ;;  %v2446_v13 = vadd.f32 %v2440_v8, %v2289_v58 }
0x1300   : > { %v2450_v14 = vsel %vm1097_vm4, %v2446_v13, 0.0  ;;  %v2447_v15 = vadd.f32 %v2443_v11, %v2290_v59 }
0x1301   : > { %2451 = vadd.xlane.f32.xlu1 %v2450_v14 }
0x1302   : > { %v2453_v16 = vsel %vm1097_vm4, %v2447_v15, 0.0 }
0x1303   : > { %2454 = vadd.xlane.f32.xlu0 %v2453_v16 }
0x138e   : > { %v2452_v17 = vpop.xlane.xlu1 %2451 }
0x138f   : > { %v2456_v18 = vmul.f32 0.03125, %v2452_v17 }
0x1390   : > { %v2455_v19 = vpop.xlane.xlu0 %2454 }
0x1391   : > { %v2458_v20 = vsub.f32 %v2446_v13, %v2456_v18  ;;  %v2457_v21 = vmul.f32 0.03125, %v2455_v19 }
0x1393   : > { %v2459_v22 = vsub.f32 %v2447_v15, %v2457_v21  ;;  %v2460_v23 = vmul.f32 %v2458_v20, %v2458_v20 }
0x1395   : > { %v2462_v24 = vsel %vm1097_vm4, %v2460_v23, 0.0  ;;  %v2461_v26 = vmul.f32 %v2459_v22, %v2459_v22 }
0x1396   : > { %2463 = vadd.xlane.f32.xlu1 %v2462_v24 }
0x1397   : > { %v2465_v29 = vsel %vm1097_vm4, %v2461_v26, 0.0 }
0x1398   : > { %2466 = vadd.xlane.f32.xlu0 %v2465_v29 }
0x1423   : > { %v2464_v30 = vpop.xlane.xlu1 %2463 }
0x1424   : > { %v2468_v31 = vmul.f32 0.03125, %v2464_v30 }
0x1425   : > { %v2467_v32 = vpop.xlane.xlu0 %2466 }
0x1426   : > { %v2470_v33 = vadd.f32 1e-05, %v2468_v31  ;;  %v2469_v34 = vmul.f32 0.03125, %v2467_v32 }
0x1428   : > { %3331 = vrsqrt.f32 %v2470_v33  ;;  %v2471_v36 = vadd.f32 1e-05, %v2469_v34 }
0x142a   : > { %3333 = vrsqrt.f32 %v2471_v36 }
0x1432   : > { %v3332_v37 = vpop.eup %3331 }
0x1433   : > { %v2474_v39 = vmul.f32 %v3332_v37, %v2458_v20 }
0x1434   : > { %v3334_v28 = vpop.eup %3333 }
0x1435   : > { %v2482_v41 = vmul.f32 %v2894_v27, %v2474_v39  ;;  %v2475_v42 = vmul.f32 %v3334_v28, %v2459_v22  ;;  %2497 = sbr.rel (%p2896_p0) target bundleno = 5398 (0x1516), region = 140 }
0x1437   : > { %v2490_v44 = vadd.f32 %v2895_v40, %v2482_v41  ;;  %v2483_v45 = vmul.f32 %v2894_v27, %v2475_v42 }
0x1439   : > { %2492 = vst.msk [vmem:[#allocation2] sm:$0xff] %vm1097_vm4, %v2490_v44  ;;  %v2491_v47 = vadd.f32 %v2895_v40, %v2483_v45 }
0x143b   : > { %2493 = vst.msk [vmem:[#allocation2 + $0x8] sm:$0xff] %vm1097_vm4, %v2491_v47  ;;  %v2498_v51 = vpack.c.bf16 (!%p2896_p0), %v2491_v47, %v2490_v44 }
0x143d   : > { %3135 = vmatmul.mubr.msk.bf16.vlgmr.msra.gmra.mrb[0].mxu0 %vm1097_vm4, %v2498_v51 }
0x1510   : > { %v2559_v53 = vpop.f32.mrb[0].mxu0 }
0x1511   : > { %v2560_v54 = vadd.f32 %v2897_v52, %v2559_v53  ;;  %v3136_v55 = vpop.f32.mrb[1].mxu0 }
0x1512   : > { %v2562_v43 = vpop.f32.mrb[2].mxu0 }
0x1513   : > { %2566 = vst [vmem:[#allocation16] sm:$0xff] %v2560_v54  ;;  %v2563_v56 = vadd.f32 %v2897_v52, %v2562_v43  ;;  %v3137_v57 = vpop.f32.mrb[3].mxu0 }
0x1515   : > { %2567 = vst [vmem:[#allocation16 + $0x8] sm:$0xff] %v2563_v56 }
0x1516 PF: > { %p3206_p6 = scmp.eq.s32.totalorder %s3855_s2, 1  ;;  %s3723_s13 = smov [#allocation16]  }
0x1517   : > { %s2577_s28 = sshll.u32 %s3723_s13, 4  ;;  %s2578_s28 = int_to_ptr.vmem [resolvable:$true] %s2577_s28 }
0x1518   : > { %s3599_s1 = scalar_lea.vmem %s2578_s28, 256  ;;  %p3606_p8 = scmp.lt.s32.totalorder %s2578_s28, %s2578_s28 }
0x1519   : > { %p3600_p9 = scmp.ne.s32.totalorder %s2578_s28, %s3599_s1  ;;  %p3607_p4 = scmp.lt.s32.totalorder %s3599_s1, %s3599_s1 }
0x151b   : > { %p3601_p13 = pnand %p3600_p9, %p3206_p6  ;;  %p3608_p12 = por %p3607_p4, %p3606_p8 }
0x151d   : > { %p3602_p7 = pneg %p3601_p13 }
0x151f   : > { %p3609_p3 = pnand %p3608_p12, %p3602_p7 }
0x1521   : > { %3612 = shalt.err (!%p3609_p3)
}
0x1522   : > { %s4605_s9 = sld [smem:[#allocation45_spill]] }
0x1528   : > { %s3613_s23 = scalar_lea.hbm %s4605_s9, 256 }
0x1529   : > { %p3614_p10 = scmp.ne.s32.totalorder %s4605_s9, %s3613_s23  ;;  %p3619_p2 = scmp.lt.u32.totalorder %s3613_s23, %s4605_s9 }
0x152b   : > { %p3615_p11 = pnand %p3614_p10, %p3206_p6 }
0x152d   : > { %p3616_p5 = pneg %p3615_p11 }
0x152f   : > { %p3621_p1 = pnand %p3619_p2, %p3616_p5 }
0x1531   : > { %3624 = shalt.err (!%p3621_p1)
}
0x1532   : > { %s3724_s11 = smov 128   ;;  %s3725_s0 = smov 8  }
0x1533   : > { %3165 = dma.vmem_to_hbm [thread:$0]  (%p3206_p6), %s2578_s28, 256, %s4605_s9, [#allocation5], %s3724_s11, %s3724_s11, %s3725_s0  }
0x1534   : > { %3666 = dma.done.wait (%p3206_p6), [#allocation5], 256  }
0x1535   : > { %3668 = vsyncadd (%p3206_p6), [#allocation5], 4294967040 }
0x1536 PF: > { %s4606_s8 = sld [smem:[#allocation24_spill]]  ;;  %s4607_s20 = sld [smem:[#allocation22_spill]] }
0x1537   : > { %s4608_s6 = sld [smem:[#allocation26_spill]]  ;;  %s4609_s21 = sld [smem:[#allocation23_spill]] }
0x1538   : > { %s4610_s1 = sld [smem:[#allocation25_spill]]  ;;  %s4611_s0 = smov %s3675_s30 }
0x153c   : > { %s33_s22 = sadd.s32 1, %s4606_s8   ;;  %s4612_s30 = smov %s4607_s20 }
0x153d   : > { %p30_p0 = scmp.ge.s32.totalorder %s33_s22, 4   ;;  %s4613_s20 = smov %s4608_s6 }
0x153f   :  { %32 = sbr.rel (!%p30_p0) target bundleno = 26 (0x1a), region = 226 }
0x1546   :  { %2593 = vsyncpa [#allocation4], 1 }
0x1547   :  { %2595 = vsyncpa [#allocation4 + $0x1], 1 }
0x1548   :  { %2596 = vsyncpa [#allocation7], 1 }
0x1549   :  { %2597 = vsyncpa [#allocation10], 1 }
0x154a   :  { %2598 = vsyncpa [#allocation5], 1 }
0x154b   :  { %2600 = vsyncpa [#allocation5 + $0x1], 1 }

</bundles_post_ra>
